<compile_context>
chip_gen: v5e
topology: v5e:2x2
jax: 0.10.0
libtpu: 0.0.40
codegen_flags: <defaults>
</compile_context>

<pallas_src>
import functools

import jax
import jax.numpy as jnp
from jax.experimental import pallas as pl
from jax.experimental.pallas import tpu as pltpu

KSIZE = 3  # Upsample uses conv_nd(dims, channels, out_channels, 3, padding=1)


# =================================================================================
# Host-side weight folding:
#   3x3 conv over nearest-2x-upsampled x  ==  4 sub-pixel phase 2x2 convs over x.
# For output phase (r, s) (row/col parity) and 2x2 tap (u, v) on the 1-padded
# original input xp:
#   y[2a+r, 2b+s] = sum_{u,v} Wp[r,s,u,v] . xp[a+r+u, b+s+v]
# where Wp[r,s,u,v] sums original 3x3 taps:
#   rows: r=0 -> u=0:{0}, u=1:{1,2};   r=1 -> u=0:{0,1}, u=1:{2}   (same fold for cols/s/v)
# =================================================================================
def _fold_phase_weights(w_hwio):
    w = w_hwio.astype(jnp.float32)                                 # (3, 3, C, Cout)
    rows = {0: (w[0], w[1] + w[2]), 1: (w[0] + w[1], w[2])}
    taps = []
    for r in range(2):
        for s in range(2):
            for u in range(2):
                wr = rows[r][u]                                    # (3, C, Cout) col taps
                cols = (wr[0], wr[1] + wr[2]) if s == 0 else (wr[0] + wr[1], wr[2])
                for v in range(2):
                    taps.append(cols[v])
    return jnp.stack(taps, axis=0)                                 # (16, C, Cout)


def make_upsample_params(w_hwio_f32, bias_f32):
    """Precompute (once) folded phase weights (bf16 MXU operands) and f32 bias."""
    cout = w_hwio_f32.shape[-1]
    return {
        "wp": _fold_phase_weights(w_hwio_f32).astype(jnp.bfloat16),   # (16, C, Cout)
        "b": bias_f32.astype(jnp.float32).reshape(1, cout),           # (1, Cout)
    }


# =================================================================================
# Pallas kernel: 4 phase-convs (16 K=C matmuls) on the original-resolution tile
# =================================================================================
def _upsample_phase_conv_kernel(xp_ref, w_ref, b_ref, o_ref):
    # xp_ref : (1, H+2, W+2, C)      bf16  zero-padded ORIGINAL-resolution NHWC tile
    # w_ref  : (16, C, Cout)         bf16  folded phase weights, idx = ((r*2+s)*2+u)*2+v
    # b_ref  : (1, Cout)             f32
    # o_ref  : (1, H, 2, W, 2*Cout)  f32   phase-interleaved (free reshape to (2H, 2W, Cout))
    h = o_ref.shape[1]
    w = o_ref.shape[3]
    cout = o_ref.shape[4] // 2
    c = xp_ref.shape[3]

    xp = xp_ref[0]                                        # (H+2, W+2, C) bf16 — stays bf16
    # Three column-shifted slabs (one static sublane shift each); every window below is a
    # free major-axis row slice of one of these.
    cols = [xp[:, j:j + w, :] for j in range(KSIZE)]      # each (H+2, W, C)
    bias = b_ref[...]                                     # (1, Cout) f32

    for r in range(2):                                    # output row parity
        for s in range(2):                                # output col parity
            acc = jnp.zeros((h * w, cout), jnp.float32)   # small per-phase accumulator
            for u in range(2):
                for v in range(2):
                    win = cols[s + v][r + u:r + u + h].reshape(h * w, c)   # (H*W, C) bf16
                    tap = ((r * 2 + s) * 2 + u) * 2 + v
                    acc = acc + jnp.dot(win, w_ref[tap],
                                        preferred_element_type=jnp.float32)
            acc = acc + bias                              # f32 epilogue
            # Dense, 128-lane-aligned store of this phase.
            o_ref[0, :, r, :, s * cout:(s + 1) * cout] = acc.reshape(h, w, cout)


# =================================================================================
# Wrapper: PyTorch-style NCHW in/out, nearest 2x upsample (+ optional fused conv)
# =================================================================================
def upsample_forward(x_nchw, params=None, *, use_conv=True):
    """Upsample.forward (dims=2): nearest 2x upsample, then optional 3x3 conv (padding=1)."""
    if not use_conv:
        # Pure data movement; leave to XLA.
        return jnp.repeat(jnp.repeat(x_nchw, 2, axis=2), 2, axis=3)

    b_sz, c, h, w = x_nchw.shape
    cout = params["wp"].shape[-1]

    x = jnp.transpose(x_nchw, (0, 2, 3, 1)).astype(jnp.bfloat16)   # NHWC, C on lanes
    xp = jnp.pad(x, ((0, 0), (1, 1), (1, 1), (0, 0)))              # 1-px halo, ORIGINAL resolution

    out = pl.pallas_call(
        _upsample_phase_conv_kernel,
        out_shape=jax.ShapeDtypeStruct((b_sz, h, 2, w, 2 * cout), jnp.float32),
        grid=(b_sz,),
        in_specs=[
            pl.BlockSpec((1, h + 2, w + 2, c), lambda n: (n, 0, 0, 0)),
            pl.BlockSpec((16, c, cout), lambda n: (0, 0, 0)),
            pl.BlockSpec((1, cout), lambda n: (0, 0)),
        ],
        out_specs=pl.BlockSpec((1, h, 2, w, 2 * cout), lambda n: (n, 0, 0, 0, 0)),
        compiler_params=pltpu.CompilerParams(dimension_semantics=("parallel",)),
        cost_estimate=pl.CostEstimate(
            flops=2 * b_sz * 16 * h * w * c * cout,
            transcendentals=0,
            bytes_accessed=(b_sz * (h + 2) * (w + 2) * c * 2
                            + 16 * c * cout * 2 + cout * 4
                            + b_sz * 4 * h * w * cout * 4)),
        # TODO(synk): for UNet-scale maps on v7x (64 MiB VMEM), add a parallel spatial grid axis
        # (tile over H with a 1-row halo) and K-pack tap pairs to 256 when C == 128.
    )(xp, params["wp"], params["b"])

    out = out.reshape(b_sz, 2 * h, 2 * w, cout)   # free contiguous merge of (H,2) and (W,2)
    return jnp.transpose(out, (0, 3, 1, 2))       # NHWC -> NCHW (module contract)


# =================================================================================
# Plain-JAX reference (nearest 2x upsample + 3x3 SAME conv) for validation
# =================================================================================
def _reference_forward(x_nchw, w_hwio_f32, b_f32):
    x = jnp.transpose(x_nchw, (0, 2, 3, 1))
    x = x.astype(jnp.bfloat16).astype(jnp.float32)
    up = jnp.repeat(jnp.repeat(x, 2, axis=1), 2, axis=2)
    wf = w_hwio_f32.astype(jnp.bfloat16).astype(jnp.float32)
    y = jax.lax.conv_general_dilated(
        up, wf, window_strides=(1, 1), padding="SAME",
        dimension_numbers=("NHWC", "HWIO", "NHWC"),
        precision=jax.lax.Precision.HIGHEST)
    y = y + b_f32[None, None, None, :]
    return jnp.transpose(y, (0, 3, 1, 2))


# =================================================================================
if __name__ == "__main__":
    # Small but TPU-friendly shapes consistent with a UNet decoder Upsample block:
    # batch=2, channels=128 (lane-dense), spatial=8 -> output spatial=16.
    B, C, H, W = 2, 128, 8, 8
    COUT = C                                   # out_channels=None -> channels

    key = jax.random.PRNGKey(0)
    kx, kw, kb = jax.random.split(key, 3)
    x = jax.random.normal(kx, (B, C, H, W), jnp.float32)
    w_hwio = jax.random.normal(kw, (KSIZE, KSIZE, C, COUT), jnp.float32) * 0.05
    bias = jax.random.normal(kb, (COUT,), jnp.float32) * 0.02

    params = make_upsample_params(w_hwio, bias)    # folded phase weights, computed once

    fwd = jax.jit(functools.partial(upsample_forward, use_conv=True))
    out = jax.block_until_ready(fwd(x, params))

    assert out.shape == (B, COUT, 2 * H, 2 * W), out.shape
    assert bool(jnp.all(jnp.isfinite(out)))

    ref = _reference_forward(x, w_hwio, bias)
    max_err = float(jnp.max(jnp.abs(out - ref)))
    assert bool(jnp.allclose(out, ref, atol=5e-2, rtol=5e-2)), max_err

    # use_conv=False path (pure nearest upsample) sanity check.
    up = jax.block_until_ready(upsample_forward(x, None, use_conv=False))
    assert up.shape == (B, C, 2 * H, 2 * W)

    print("KERNEL_OK")
</pallas_src>

<mosaic_0001>
module attributes {stable_mosaic.version = 11 : i64} {
  func.func @_upsample_phase_conv_kernel(%arg0: i32, %arg1: memref<1x10x10x128xbf16, #tpu.memory_space<vmem>>, %arg2: memref<16x128x128xbf16, #tpu.memory_space<vmem>>, %arg3: memref<1x128xf32, #tpu.memory_space<vmem>>, %arg4: memref<1x8x2x8x256xf32, #tpu.memory_space<vmem>>) attributes {dimension_semantics = [#tpu.dimension_semantics<parallel>], iteration_bounds = array<i64: 2>, scalar_prefetch = 0 : i64, scratch_operands = 0 : i64, tpu.core_type = #tpu.core_type<tc>, window_params = [{transform_indices = @transform_0, window_bounds = array<i64: 1, 10, 10, 128>}, {pipeline_mode = #tpu.pipeline_mode<synchronous>, transform_indices = @transform_1, window_bounds = array<i64: 16, 128, 128>}, {pipeline_mode = #tpu.pipeline_mode<synchronous>, transform_indices = @transform_2, window_bounds = array<i64: 1, 128>}, {transform_indices = @transform_3, window_bounds = array<i64: 1, 8, 2, 8, 256>}]} {
    %c0 = arith.constant 0 : index
    %c0_0 = arith.constant 0 : index
    %c0_1 = arith.constant 0 : index
    %c0_2 = arith.constant 0 : index
    %0 = vector.load %arg1[%c0, %c0_0, %c0_1, %c0_2] : memref<1x10x10x128xbf16, #tpu.memory_space<vmem>>, vector<1x10x10x128xbf16>
    %1 = vector.shape_cast %0 : vector<1x10x10x128xbf16> to vector<10x10x128xbf16>
    %2 = vector.extract_strided_slice %1 {offsets = [0, 0, 0], sizes = [10, 8, 128], strides = [1, 1, 1]} : vector<10x10x128xbf16> to vector<10x8x128xbf16>
    %3 = vector.extract_strided_slice %1 {offsets = [0, 1, 0], sizes = [10, 8, 128], strides = [1, 1, 1]} : vector<10x10x128xbf16> to vector<10x8x128xbf16>
    %4 = vector.extract_strided_slice %1 {offsets = [0, 2, 0], sizes = [10, 8, 128], strides = [1, 1, 1]} : vector<10x10x128xbf16> to vector<10x8x128xbf16>
    %c0_3 = arith.constant 0 : index
    %c0_4 = arith.constant 0 : index
    %5 = vector.load %arg3[%c0_3, %c0_4] : memref<1x128xf32, #tpu.memory_space<vmem>>, vector<1x128xf32>
    %cst = arith.constant 0.000000e+00 : f32
    %6 = vector.broadcast %cst : f32 to vector<64x128xf32>
    %7 = vector.extract_strided_slice %2 {offsets = [0, 0, 0], sizes = [8, 8, 128], strides = [1, 1, 1]} : vector<10x8x128xbf16> to vector<8x8x128xbf16>
    %8 = vector.shape_cast %7 : vector<8x8x128xbf16> to vector<64x128xbf16>
    %c0_5 = arith.constant 0 : index
    %c0_6 = arith.constant 0 : index
    %c0_7 = arith.constant 0 : index
    %9 = vector.load %arg2[%c0_5, %c0_6, %c0_7] : memref<16x128x128xbf16, #tpu.memory_space<vmem>>, vector<1x128x128xbf16>
    %10 = vector.shape_cast %9 : vector<1x128x128xbf16> to vector<128x128xbf16>
    %cst_8 = arith.constant dense<0.000000e+00> : vector<64x128xf32>
    %11 = tpu.matmul %8, %10, %cst_8 {dimension_numbers = #tpu.dot_dimension_numbers<[1], [0], [0], [1], [0, 0, 1, 1], [], []>} : vector<64x128xbf16>, vector<128x128xbf16>, vector<64x128xf32> -> vector<64x128xf32>
    %12 = arith.addf %6, %11 : vector<64x128xf32>
    %13 = vector.extract_strided_slice %3 {offsets = [0, 0, 0], sizes = [8, 8, 128], strides = [1, 1, 1]} : vector<10x8x128xbf16> to vector<8x8x128xbf16>
    %14 = vector.shape_cast %13 : vector<8x8x128xbf16> to vector<64x128xbf16>
    %c1 = arith.constant 1 : index
    %c0_9 = arith.constant 0 : index
    %c0_10 = arith.constant 0 : index
    %15 = vector.load %arg2[%c1, %c0_9, %c0_10] : memref<16x128x128xbf16, #tpu.memory_space<vmem>>, vector<1x128x128xbf16>
    %16 = vector.shape_cast %15 : vector<1x128x128xbf16> to vector<128x128xbf16>
    %cst_11 = arith.constant dense<0.000000e+00> : vector<64x128xf32>
    %17 = tpu.matmul %14, %16, %cst_11 {dimension_numbers = #tpu.dot_dimension_numbers<[1], [0], [0], [1], [0, 0, 1, 1], [], []>} : vector<64x128xbf16>, vector<128x128xbf16>, vector<64x128xf32> -> vector<64x128xf32>
    %18 = arith.addf %12, %17 : vector<64x128xf32>
    %19 = vector.extract_strided_slice %2 {offsets = [1, 0, 0], sizes = [8, 8, 128], strides = [1, 1, 1]} : vector<10x8x128xbf16> to vector<8x8x128xbf16>
    %20 = vector.shape_cast %19 : vector<8x8x128xbf16> to vector<64x128xbf16>
    %c2 = arith.constant 2 : index
    %c0_12 = arith.constant 0 : index
    %c0_13 = arith.constant 0 : index
    %21 = vector.load %arg2[%c2, %c0_12, %c0_13] : memref<16x128x128xbf16, #tpu.memory_space<vmem>>, vector<1x128x128xbf16>
    %22 = vector.shape_cast %21 : vector<1x128x128xbf16> to vector<128x128xbf16>
    %cst_14 = arith.constant dense<0.000000e+00> : vector<64x128xf32>
    %23 = tpu.matmul %20, %22, %cst_14 {dimension_numbers = #tpu.dot_dimension_numbers<[1], [0], [0], [1], [0, 0, 1, 1], [], []>} : vector<64x128xbf16>, vector<128x128xbf16>, vector<64x128xf32> -> vector<64x128xf32>
    %24 = arith.addf %18, %23 : vector<64x128xf32>
    %25 = vector.extract_strided_slice %3 {offsets = [1, 0, 0], sizes = [8, 8, 128], strides = [1, 1, 1]} : vector<10x8x128xbf16> to vector<8x8x128xbf16>
    %26 = vector.shape_cast %25 : vector<8x8x128xbf16> to vector<64x128xbf16>
    %c3 = arith.constant 3 : index
    %c0_15 = arith.constant 0 : index
    %c0_16 = arith.constant 0 : index
    %27 = vector.load %arg2[%c3, %c0_15, %c0_16] : memref<16x128x128xbf16, #tpu.memory_space<vmem>>, vector<1x128x128xbf16>
    %28 = vector.shape_cast %27 : vector<1x128x128xbf16> to vector<128x128xbf16>
    %cst_17 = arith.constant dense<0.000000e+00> : vector<64x128xf32>
    %29 = tpu.matmul %26, %28, %cst_17 {dimension_numbers = #tpu.dot_dimension_numbers<[1], [0], [0], [1], [0, 0, 1, 1], [], []>} : vector<64x128xbf16>, vector<128x128xbf16>, vector<64x128xf32> -> vector<64x128xf32>
    %30 = arith.addf %24, %29 : vector<64x128xf32>
    %31 = vector.broadcast %5 : vector<1x128xf32> to vector<64x128xf32>
    %32 = arith.addf %30, %31 : vector<64x128xf32>
    %33 = vector.shape_cast %32 : vector<64x128xf32> to vector<8x8x128xf32>
    %c0_18 = arith.constant 0 : index
    %c0_19 = arith.constant 0 : index
    %c0_20 = arith.constant 0 : index
    %c0_21 = arith.constant 0 : index
    %c0_22 = arith.constant 0 : index
    %34 = vector.load %arg4[%c0_18, %c0_19, %c0_20, %c0_21, %c0_22] : memref<1x8x2x8x256xf32, #tpu.memory_space<vmem>>, vector<1x8x1x8x128xf32>
    %35 = vector.shape_cast %34 : vector<1x8x1x8x128xf32> to vector<8x8x128xf32>
    %36 = vector.shape_cast %33 : vector<8x8x128xf32> to vector<1x8x1x8x128xf32>
    tpu.vector_store %arg4[%c0_18, %c0_19, %c0_20, %c0_21, %c0_22], %36 {strides = array<i32>} : memref<1x8x2x8x256xf32, #tpu.memory_space<vmem>>, vector<1x8x1x8x128xf32>,
    %cst_23 = arith.constant 0.000000e+00 : f32
    %37 = vector.broadcast %cst_23 : f32 to vector<64x128xf32>
    %38 = vector.extract_strided_slice %3 {offsets = [0, 0, 0], sizes = [8, 8, 128], strides = [1, 1, 1]} : vector<10x8x128xbf16> to vector<8x8x128xbf16>
    %39 = vector.shape_cast %38 : vector<8x8x128xbf16> to vector<64x128xbf16>
    %c4 = arith.constant 4 : index
    %c0_24 = arith.constant 0 : index
    %c0_25 = arith.constant 0 : index
    %40 = vector.load %arg2[%c4, %c0_24, %c0_25] : memref<16x128x128xbf16, #tpu.memory_space<vmem>>, vector<1x128x128xbf16>
    %41 = vector.shape_cast %40 : vector<1x128x128xbf16> to vector<128x128xbf16>
    %cst_26 = arith.constant dense<0.000000e+00> : vector<64x128xf32>
    %42 = tpu.matmul %39, %41, %cst_26 {dimension_numbers = #tpu.dot_dimension_numbers<[1], [0], [0], [1], [0, 0, 1, 1], [], []>} : vector<64x128xbf16>, vector<128x128xbf16>, vector<64x128xf32> -> vector<64x128xf32>
    %43 = arith.addf %37, %42 : vector<64x128xf32>
    %44 = vector.extract_strided_slice %4 {offsets = [0, 0, 0], sizes = [8, 8, 128], strides = [1, 1, 1]} : vector<10x8x128xbf16> to vector<8x8x128xbf16>
    %45 = vector.shape_cast %44 : vector<8x8x128xbf16> to vector<64x128xbf16>
    %c5 = arith.constant 5 : index
    %c0_27 = arith.constant 0 : index
    %c0_28 = arith.constant 0 : index
    %46 = vector.load %arg2[%c5, %c0_27, %c0_28] : memref<16x128x128xbf16, #tpu.memory_space<vmem>>, vector<1x128x128xbf16>
    %47 = vector.shape_cast %46 : vector<1x128x128xbf16> to vector<128x128xbf16>
    %cst_29 = arith.constant dense<0.000000e+00> : vector<64x128xf32>
    %48 = tpu.matmul %45, %47, %cst_29 {dimension_numbers = #tpu.dot_dimension_numbers<[1], [0], [0], [1], [0, 0, 1, 1], [], []>} : vector<64x128xbf16>, vector<128x128xbf16>, vector<64x128xf32> -> vector<64x128xf32>
    %49 = arith.addf %43, %48 : vector<64x128xf32>
    %50 = vector.extract_strided_slice %3 {offsets = [1, 0, 0], sizes = [8, 8, 128], strides = [1, 1, 1]} : vector<10x8x128xbf16> to vector<8x8x128xbf16>
    %51 = vector.shape_cast %50 : vector<8x8x128xbf16> to vector<64x128xbf16>
    %c6 = arith.constant 6 : index
    %c0_30 = arith.constant 0 : index
    %c0_31 = arith.constant 0 : index
    %52 = vector.load %arg2[%c6, %c0_30, %c0_31] : memref<16x128x128xbf16, #tpu.memory_space<vmem>>, vector<1x128x128xbf16>
    %53 = vector.shape_cast %52 : vector<1x128x128xbf16> to vector<128x128xbf16>
    %cst_32 = arith.constant dense<0.000000e+00> : vector<64x128xf32>
    %54 = tpu.matmul %51, %53, %cst_32 {dimension_numbers = #tpu.dot_dimension_numbers<[1], [0], [0], [1], [0, 0, 1, 1], [], []>} : vector<64x128xbf16>, vector<128x128xbf16>, vector<64x128xf32> -> vector<64x128xf32>
    %55 = arith.addf %49, %54 : vector<64x128xf32>
    %56 = vector.extract_strided_slice %4 {offsets = [1, 0, 0], sizes = [8, 8, 128], strides = [1, 1, 1]} : vector<10x8x128xbf16> to vector<8x8x128xbf16>
    %57 = vector.shape_cast %56 : vector<8x8x128xbf16> to vector<64x128xbf16>
    %c7 = arith.constant 7 : index
    %c0_33 = arith.constant 0 : index
    %c0_34 = arith.constant 0 : index
    %58 = vector.load %arg2[%c7, %c0_33, %c0_34] : memref<16x128x128xbf16, #tpu.memory_space<vmem>>, vector<1x128x128xbf16>
    %59 = vector.shape_cast %58 : vector<1x128x128xbf16> to vector<128x128xbf16>
    %cst_35 = arith.constant dense<0.000000e+00> : vector<64x128xf32>
    %60 = tpu.matmul %57, %59, %cst_35 {dimension_numbers = #tpu.dot_dimension_numbers<[1], [0], [0], [1], [0, 0, 1, 1], [], []>} : vector<64x128xbf16>, vector<128x128xbf16>, vector<64x128xf32> -> vector<64x128xf32>
    %61 = arith.addf %55, %60 : vector<64x128xf32>
    %62 = vector.broadcast %5 : vector<1x128xf32> to vector<64x128xf32>
    %63 = arith.addf %61, %62 : vector<64x128xf32>
    %64 = vector.shape_cast %63 : vector<64x128xf32> to vector<8x8x128xf32>
    %c0_36 = arith.constant 0 : index
    %c0_37 = arith.constant 0 : index
    %c0_38 = arith.constant 0 : index
    %c0_39 = arith.constant 0 : index
    %c128 = arith.constant 128 : index
    %65 = vector.load %arg4[%c0_36, %c0_37, %c0_38, %c0_39, %c128] : memref<1x8x2x8x256xf32, #tpu.memory_space<vmem>>, vector<1x8x1x8x128xf32>
    %66 = vector.shape_cast %65 : vector<1x8x1x8x128xf32> to vector<8x8x128xf32>
    %67 = vector.shape_cast %64 : vector<8x8x128xf32> to vector<1x8x1x8x128xf32>
    tpu.vector_store %arg4[%c0_36, %c0_37, %c0_38, %c0_39, %c128], %67 {strides = array<i32>} : memref<1x8x2x8x256xf32, #tpu.memory_space<vmem>>, vector<1x8x1x8x128xf32>,
    %cst_40 = arith.constant 0.000000e+00 : f32
    %68 = vector.broadcast %cst_40 : f32 to vector<64x128xf32>
    %69 = vector.extract_strided_slice %2 {offsets = [1, 0, 0], sizes = [8, 8, 128], strides = [1, 1, 1]} : vector<10x8x128xbf16> to vector<8x8x128xbf16>
    %70 = vector.shape_cast %69 : vector<8x8x128xbf16> to vector<64x128xbf16>
    %c8 = arith.constant 8 : index
    %c0_41 = arith.constant 0 : index
    %c0_42 = arith.constant 0 : index
    %71 = vector.load %arg2[%c8, %c0_41, %c0_42] : memref<16x128x128xbf16, #tpu.memory_space<vmem>>, vector<1x128x128xbf16>
    %72 = vector.shape_cast %71 : vector<1x128x128xbf16> to vector<128x128xbf16>
    %cst_43 = arith.constant dense<0.000000e+00> : vector<64x128xf32>
    %73 = tpu.matmul %70, %72, %cst_43 {dimension_numbers = #tpu.dot_dimension_numbers<[1], [0], [0], [1], [0, 0, 1, 1], [], []>} : vector<64x128xbf16>, vector<128x128xbf16>, vector<64x128xf32> -> vector<64x128xf32>
    %74 = arith.addf %68, %73 : vector<64x128xf32>
    %75 = vector.extract_strided_slice %3 {offsets = [1, 0, 0], sizes = [8, 8, 128], strides = [1, 1, 1]} : vector<10x8x128xbf16> to vector<8x8x128xbf16>
    %76 = vector.shape_cast %75 : vector<8x8x128xbf16> to vector<64x128xbf16>
    %c9 = arith.constant 9 : index
    %c0_44 = arith.constant 0 : index
    %c0_45 = arith.constant 0 : index
    %77 = vector.load %arg2[%c9, %c0_44, %c0_45] : memref<16x128x128xbf16, #tpu.memory_space<vmem>>, vector<1x128x128xbf16>
    %78 = vector.shape_cast %77 : vector<1x128x128xbf16> to vector<128x128xbf16>
    %cst_46 = arith.constant dense<0.000000e+00> : vector<64x128xf32>
    %79 = tpu.matmul %76, %78, %cst_46 {dimension_numbers = #tpu.dot_dimension_numbers<[1], [0], [0], [1], [0, 0, 1, 1], [], []>} : vector<64x128xbf16>, vector<128x128xbf16>, vector<64x128xf32> -> vector<64x128xf32>
    %80 = arith.addf %74, %79 : vector<64x128xf32>
    %81 = vector.extract_strided_slice %2 {offsets = [2, 0, 0], sizes = [8, 8, 128], strides = [1, 1, 1]} : vector<10x8x128xbf16> to vector<8x8x128xbf16>
    %82 = vector.shape_cast %81 : vector<8x8x128xbf16> to vector<64x128xbf16>
    %c10 = arith.constant 10 : index
    %c0_47 = arith.constant 0 : index
    %c0_48 = arith.constant 0 : index
    %83 = vector.load %arg2[%c10, %c0_47, %c0_48] : memref<16x128x128xbf16, #tpu.memory_space<vmem>>, vector<1x128x128xbf16>
    %84 = vector.shape_cast %83 : vector<1x128x128xbf16> to vector<128x128xbf16>
    %cst_49 = arith.constant dense<0.000000e+00> : vector<64x128xf32>
    %85 = tpu.matmul %82, %84, %cst_49 {dimension_numbers = #tpu.dot_dimension_numbers<[1], [0], [0], [1], [0, 0, 1, 1], [], []>} : vector<64x128xbf16>, vector<128x128xbf16>, vector<64x128xf32> -> vector<64x128xf32>
    %86 = arith.addf %80, %85 : vector<64x128xf32>
    %87 = vector.extract_strided_slice %3 {offsets = [2, 0, 0], sizes = [8, 8, 128], strides = [1, 1, 1]} : vector<10x8x128xbf16> to vector<8x8x128xbf16>
    %88 = vector.shape_cast %87 : vector<8x8x128xbf16> to vector<64x128xbf16>
    %c11 = arith.constant 11 : index
    %c0_50 = arith.constant 0 : index
    %c0_51 = arith.constant 0 : index
    %89 = vector.load %arg2[%c11, %c0_50, %c0_51] : memref<16x128x128xbf16, #tpu.memory_space<vmem>>, vector<1x128x128xbf16>
    %90 = vector.shape_cast %89 : vector<1x128x128xbf16> to vector<128x128xbf16>
    %cst_52 = arith.constant dense<0.000000e+00> : vector<64x128xf32>
    %91 = tpu.matmul %88, %90, %cst_52 {dimension_numbers = #tpu.dot_dimension_numbers<[1], [0], [0], [1], [0, 0, 1, 1], [], []>} : vector<64x128xbf16>, vector<128x128xbf16>, vector<64x128xf32> -> vector<64x128xf32>
    %92 = arith.addf %86, %91 : vector<64x128xf32>
    %93 = vector.broadcast %5 : vector<1x128xf32> to vector<64x128xf32>
    %94 = arith.addf %92, %93 : vector<64x128xf32>
    %95 = vector.shape_cast %94 : vector<64x128xf32> to vector<8x8x128xf32>
    %c0_53 = arith.constant 0 : index
    %c0_54 = arith.constant 0 : index
    %c1_55 = arith.constant 1 : index
    %c0_56 = arith.constant 0 : index
    %c0_57 = arith.constant 0 : index
    %96 = vector.load %arg4[%c0_53, %c0_54, %c1_55, %c0_56, %c0_57] : memref<1x8x2x8x256xf32, #tpu.memory_space<vmem>>, vector<1x8x1x8x128xf32>
    %97 = vector.shape_cast %96 : vector<1x8x1x8x128xf32> to vector<8x8x128xf32>
    %98 = vector.shape_cast %95 : vector<8x8x128xf32> to vector<1x8x1x8x128xf32>
    tpu.vector_store %arg4[%c0_53, %c0_54, %c1_55, %c0_56, %c0_57], %98 {strides = array<i32>} : memref<1x8x2x8x256xf32, #tpu.memory_space<vmem>>, vector<1x8x1x8x128xf32>,
    %cst_58 = arith.constant 0.000000e+00 : f32
    %99 = vector.broadcast %cst_58 : f32 to vector<64x128xf32>
    %100 = vector.extract_strided_slice %3 {offsets = [1, 0, 0], sizes = [8, 8, 128], strides = [1, 1, 1]} : vector<10x8x128xbf16> to vector<8x8x128xbf16>
    %101 = vector.shape_cast %100 : vector<8x8x128xbf16> to vector<64x128xbf16>
    %c12 = arith.constant 12 : index
    %c0_59 = arith.constant 0 : index
    %c0_60 = arith.constant 0 : index
    %102 = vector.load %arg2[%c12, %c0_59, %c0_60] : memref<16x128x128xbf16, #tpu.memory_space<vmem>>, vector<1x128x128xbf16>
    %103 = vector.shape_cast %102 : vector<1x128x128xbf16> to vector<128x128xbf16>
    %cst_61 = arith.constant dense<0.000000e+00> : vector<64x128xf32>
    %104 = tpu.matmul %101, %103, %cst_61 {dimension_numbers = #tpu.dot_dimension_numbers<[1], [0], [0], [1], [0, 0, 1, 1], [], []>} : vector<64x128xbf16>, vector<128x128xbf16>, vector<64x128xf32> -> vector<64x128xf32>
    %105 = arith.addf %99, %104 : vector<64x128xf32>
    %106 = vector.extract_strided_slice %4 {offsets = [1, 0, 0], sizes = [8, 8, 128], strides = [1, 1, 1]} : vector<10x8x128xbf16> to vector<8x8x128xbf16>
    %107 = vector.shape_cast %106 : vector<8x8x128xbf16> to vector<64x128xbf16>
    %c13 = arith.constant 13 : index
    %c0_62 = arith.constant 0 : index
    %c0_63 = arith.constant 0 : index
    %108 = vector.load %arg2[%c13, %c0_62, %c0_63] : memref<16x128x128xbf16, #tpu.memory_space<vmem>>, vector<1x128x128xbf16>
    %109 = vector.shape_cast %108 : vector<1x128x128xbf16> to vector<128x128xbf16>
    %cst_64 = arith.constant dense<0.000000e+00> : vector<64x128xf32>
    %110 = tpu.matmul %107, %109, %cst_64 {dimension_numbers = #tpu.dot_dimension_numbers<[1], [0], [0], [1], [0, 0, 1, 1], [], []>} : vector<64x128xbf16>, vector<128x128xbf16>, vector<64x128xf32> -> vector<64x128xf32>
    %111 = arith.addf %105, %110 : vector<64x128xf32>
    %112 = vector.extract_strided_slice %3 {offsets = [2, 0, 0], sizes = [8, 8, 128], strides = [1, 1, 1]} : vector<10x8x128xbf16> to vector<8x8x128xbf16>
    %113 = vector.shape_cast %112 : vector<8x8x128xbf16> to vector<64x128xbf16>
    %c14 = arith.constant 14 : index
    %c0_65 = arith.constant 0 : index
    %c0_66 = arith.constant 0 : index
    %114 = vector.load %arg2[%c14, %c0_65, %c0_66] : memref<16x128x128xbf16, #tpu.memory_space<vmem>>, vector<1x128x128xbf16>
    %115 = vector.shape_cast %114 : vector<1x128x128xbf16> to vector<128x128xbf16>
    %cst_67 = arith.constant dense<0.000000e+00> : vector<64x128xf32>
    %116 = tpu.matmul %113, %115, %cst_67 {dimension_numbers = #tpu.dot_dimension_numbers<[1], [0], [0], [1], [0, 0, 1, 1], [], []>} : vector<64x128xbf16>, vector<128x128xbf16>, vector<64x128xf32> -> vector<64x128xf32>
    %117 = arith.addf %111, %116 : vector<64x128xf32>
    %118 = vector.extract_strided_slice %4 {offsets = [2, 0, 0], sizes = [8, 8, 128], strides = [1, 1, 1]} : vector<10x8x128xbf16> to vector<8x8x128xbf16>
    %119 = vector.shape_cast %118 : vector<8x8x128xbf16> to vector<64x128xbf16>
    %c15 = arith.constant 15 : index
    %c0_68 = arith.constant 0 : index
    %c0_69 = arith.constant 0 : index
    %120 = vector.load %arg2[%c15, %c0_68, %c0_69] : memref<16x128x128xbf16, #tpu.memory_space<vmem>>, vector<1x128x128xbf16>
    %121 = vector.shape_cast %120 : vector<1x128x128xbf16> to vector<128x128xbf16>
    %cst_70 = arith.constant dense<0.000000e+00> : vector<64x128xf32>
    %122 = tpu.matmul %119, %121, %cst_70 {dimension_numbers = #tpu.dot_dimension_numbers<[1], [0], [0], [1], [0, 0, 1, 1], [], []>} : vector<64x128xbf16>, vector<128x128xbf16>, vector<64x128xf32> -> vector<64x128xf32>
    %123 = arith.addf %117, %122 : vector<64x128xf32>
    %124 = vector.broadcast %5 : vector<1x128xf32> to vector<64x128xf32>
    %125 = arith.addf %123, %124 : vector<64x128xf32>
    %126 = vector.shape_cast %125 : vector<64x128xf32> to vector<8x8x128xf32>
    %c0_71 = arith.constant 0 : index
    %c0_72 = arith.constant 0 : index
    %c1_73 = arith.constant 1 : index
    %c0_74 = arith.constant 0 : index
    %c128_75 = arith.constant 128 : index
    %127 = vector.load %arg4[%c0_71, %c0_72, %c1_73, %c0_74, %c128_75] : memref<1x8x2x8x256xf32, #tpu.memory_space<vmem>>, vector<1x8x1x8x128xf32>
    %128 = vector.shape_cast %127 : vector<1x8x1x8x128xf32> to vector<8x8x128xf32>
    %129 = vector.shape_cast %126 : vector<8x8x128xf32> to vector<1x8x1x8x128xf32>
    tpu.vector_store %arg4[%c0_71, %c0_72, %c1_73, %c0_74, %c128_75], %129 {strides = array<i32>} : memref<1x8x2x8x256xf32, #tpu.memory_space<vmem>>, vector<1x8x1x8x128xf32>,
    return
  }
  func.func @transform_0(%arg0: i32) -> (i32, i32, i32, i32) {
    %c0_i32 = arith.constant 0 : i32
    %c0_i32_0 = arith.constant 0 : i32
    %c0_i32_1 = arith.constant 0 : i32
    %c0_i32_2 = arith.constant 0 : i32
    return %arg0, %c0_i32, %c0_i32_0, %c0_i32_1 : i32, i32, i32, i32
  }
  func.func @transform_1(%arg0: i32) -> (i32, i32, i32) {
    %c0_i32 = arith.constant 0 : i32
    %c0_i32_0 = arith.constant 0 : i32
    %c0_i32_1 = arith.constant 0 : i32
    %c0_i32_2 = arith.constant 0 : i32
    return %c0_i32, %c0_i32_0, %c0_i32_1 : i32, i32, i32
  }
  func.func @transform_2(%arg0: i32) -> (i32, i32) {
    %c0_i32 = arith.constant 0 : i32
    %c0_i32_0 = arith.constant 0 : i32
    %c0_i32_1 = arith.constant 0 : i32
    return %c0_i32, %c0_i32_0 : i32, i32
  }
  func.func @transform_3(%arg0: i32) -> (i32, i32, i32, i32, i32) {
    %c0_i32 = arith.constant 0 : i32
    %c0_i32_0 = arith.constant 0 : i32
    %c0_i32_1 = arith.constant 0 : i32
    %c0_i32_2 = arith.constant 0 : i32
    %c0_i32_3 = arith.constant 0 : i32
    return %arg0, %c0_i32, %c0_i32_0, %c0_i32_1, %c0_i32_2 : i32, i32, i32, i32, i32
  }
}

</mosaic_0001>

<bundles_post_ra>
// kernel: upsample_forward.1
= control target key start
LH: loop header
LB: loop body
LE: loop exit
PB: predicated region body
PF: predicated region fallthrough
CT: control target
= control target key end

     0   :  { %8 = vsyncpa [#allocation3], 0  ;;  %s2968_s12 = smov 0   ;;  %s3382_s0 = inlined_call_operand.vmem [shape: bf16[2,10,10,128], index: 0, kind: input, shape index: {}]   ;;  %s3383_s1 = inlined_call_operand.hbm [shape: bf16[16,128,128], index: 1, kind: input, shape index: {}]   ;;  %s3384_s2 = inlined_call_operand.vmem [shape: f32[1,128], index: 2, kind: input, shape index: {}]   ;;  %s3385_s3 = inlined_call_operand.vmem [shape: f32[2,8,2,8,256], index: 3, kind: output, shape index: {}]  }
   0x1 LB: > { %s124_s15 = sshll.u32 %s3383_s1, 4  ;;  %s2201_s16 = sadd.s32 4294967295, %s2943_s12   ;;  %s2943_s12 = sphi %s2968_s12, %s14_s12   ;;  %s125_s15 = int_to_ptr.hbm [resolvable:$true] %s124_s15 }
   0x2   : > { %p2203_p0 = scmp.ge.s32.totalorder %s2943_s12, 1  ;;  %p113_p1 = scmp.lt.s32.totalorder %s2943_s12, 3 }
   0x3   : > { %p2889_p2 = scmp.eq.s32.totalorder %s2201_s16, 0  ;;  %s2945_s17 = smov [#allocation2]  }
   0x4   : > { %p114_p3 = pnand %p2203_p0, %p113_p1  ;;  %s126_s18 = sshll.u32 %s2945_s17, 4  ;;  %s127_s18 = int_to_ptr.vmem [resolvable:$true] %s126_s18 }
   0x5   : > { %s2946_s19 = smov 64   ;;  %s2947_s20 = smov 4  }
   0x6   : > { %p2885_p4 = pneg %p114_p3  ;;  %153 = sbr.rel (%p114_p3) target bundleno = 433 (0x1b1), region = 32 }
   0x8   : > { %p2886_p5 = pnand %p2889_p2, %p2885_p4 }
   0xa   : > { %2888 = dma.hbm_to_vmem [thread:$0]  (!%p2886_p5), %s125_s15, 16384, %s127_s18, [#allocation3], %s2946_s19, %s2946_s19, %s2947_s20  }
   0xb   : > { %2938 = dma.done.wait (%p2889_p2), [#allocation3], 16384  }
   0xc   : > { %2940 = vsyncadd (%p2889_p2), [#allocation3], 4294950912  ;;  %p178_p6 = scmp.lt.s32.totalorder %s2201_s16, 1  ;;  %v2767_v0 = vld [vmem:[#allocation2 + $0x78] sm:$0xff]  ;;  %v2766_v4 = vld [vmem:[#allocation2 + $0x70] sm:$0xff]  ;;  %vm832_vm3 = vcmask 1042432  }
   0xd   : > { %v2759_v1 = vld [vmem:[#allocation2 + $0x38] sm:$0xff]  ;;  %421 = vmatpush.bf16.msra.mxu0 %v2767_v0  ;;  %v2758_v5 = vld [vmem:[#allocation2 + $0x30] sm:$0xff]  ;;  %v2765_v8 = vld [vmem:[#allocation2 + $0x68] sm:$0xff]  ;;  %vm225_vm0 = vsmask.f32 3328  ;;  %vm833_vm4 = vcmask 1046532  }
   0xe   : > { %s3391_s16 = smov (!%p178_p6, %s2201_s16), 1  ;;  %v2775_v2 = vld [vmem:[#allocation2 + $0xb8] sm:$0xff]  ;;  %522 = vmatpush.bf16.msra.mxu1 %v2759_v1  ;;  %v2774_v6 = vld [vmem:[#allocation2 + $0xb0] sm:$0xff]  ;;  %v2757_v9 = vld [vmem:[#allocation2 + $0x28] sm:$0xff]  ;;  %vm226_vm1 = vsmask.f32 7440 }
   0xf   : > { %v2783_v3 = vld [vmem:[#allocation2 + $0xf8] sm:$0xff]  ;;  %626 = vmatpush.bf16.msra.mxu2 %v2775_v2  ;;  %v2782_v7 = vld [vmem:[#allocation2 + $0xf0] sm:$0xff]  ;;  %s2880_s21 = smul.u32 80, %s3391_s16  ;;  %v2773_v10 = vld [vmem:[#allocation2 + $0xa8] sm:$0xff]  ;;  %s2751_s25 = sshll.u32 %s3391_s16, 8 }
  0x10   : > { %751 = vmatpush.bf16.msra.mxu3 %v2783_v3  ;;  %v2781_v11 = vld [vmem:[#allocation2 + $0xe8] sm:$0xff]  ;;  %v2764_v12 = vld [vmem:[#allocation2 + $0x60] sm:$0xff]  ;;  %v2763_v28 = vld [vmem:[#allocation2 + $0x58] sm:$0xff]  ;;  %s3264_s30 = scalar_lea.vmem %s3385_s3, %s2751_s25 }
  0x11   : > { %422 = vmatpush.bf16.msra.mxu0 %v2766_v4  ;;  %s2985_s24 = scalar_lea.vmem %s3382_s0, %s2880_s21  ;;  %v2756_v13 = vld [vmem:[#allocation2 + $0x20] sm:$0xff]  ;;  %v2755_v29 = vld [vmem:[#allocation2 + $0x18] sm:$0xff]  ;;  %v2762_v43 = vld [vmem:[#allocation2 + $0x50] sm:$0xff] }
  0x12   : > { %523 = vmatpush.bf16.msra.mxu1 %v2758_v5  ;;  %v2772_v14 = vld [vmem:[#allocation2 + $0xa0] sm:$0xff]  ;;  %v2994_v18 = vld [vmem:[%s2985_s24 + $0x8] sm:$0xf]  ;;  %v2997_v19 = vld [vmem:[%s2985_s24 + $0xc] sm:$0x1] }
  0x13   : > { %627 = vmatpush.bf16.msra.mxu2 %v2774_v6  ;;  %v2780_v15 = vld [vmem:[#allocation2 + $0xe0] sm:$0xff]  ;;  %v3000_v20 = vld [vmem:[%s2985_s24 + $0x10] sm:$0xf]  ;;  %v3005_v23 = vld [vmem:[%s2985_s24 + $0x14] sm:$0x1]  ;;  %v243_v25 = vshrl.u32 %v2994_v18, 16 }
  0x14   : > { %752 = vmatpush.bf16.msra.mxu3 %v2782_v7  ;;  %v2988_v16 = vld [vmem:[%s2985_s24] sm:$0xf]  ;;  %v2991_v17 = vld [vmem:[%s2985_s24 + $0x4] sm:$0x1]  ;;  %v246_v26 = vshll.u32 %v2994_v18, 16  ;;  %v252_v27 = vshll.u32 %v2997_v19, 16  ;;  %vm3015_vm2 = vmor %vm225_vm0, %vm226_vm1  ;;  %v459_v7 = vunpack.c.l.b16 %v2994_v18 }
  0x15   : > { %423 = vmatpush.bf16.msra.mxu0 %v2765_v8  ;;  %v229_v21 = vshrl.u32 %v2988_v16, 16  ;;  %v232_v22 = vshll.u32 %v2988_v16, 16  ;;  %v238_v24 = vshll.u32 %v2991_v17, 16  ;;  %v257_v32 = vshrl.u32 %v3000_v20, 16  ;;  %v2771_v34 = vld [vmem:[#allocation2 + $0x98] sm:$0xff]  ;;  %v2754_v44 = vld [vmem:[#allocation2 + $0x10] sm:$0xff]  ;;  %vm3114_vm5 = vmor %vm832_vm3, %vm833_vm4 }
  0x16   : > { %524 = vmatpush.bf16.msra.mxu1 %v2757_v9  ;;  %v260_v33 = vshll.u32 %v3000_v20, 16  ;;  %v2779_v35 = vld [vmem:[#allocation2 + $0xd8] sm:$0xff]  ;;  %v245_v36 = vrot.slane %v243_v25, 4  ;;  %v248_v37 = vrot.slane %v246_v26, 5  ;;  %v266_v41 = vshll.u32 %v3005_v23, 16  ;;  %v2770_v50 = vld [vmem:[#allocation2 + $0x90] sm:$0xff] }
  0x17   : > { %628 = vmatpush.bf16.msra.mxu2 %v2773_v10  ;;  %v231_v30 = vrot.slane %v229_v21, 4  ;;  %v234_v31 = vrot.slane %v232_v22, 5  ;;  %v259_v39 = vrot.slane %v257_v32, 4  ;;  %v240_v47 = vrot.slane %v238_v24, 5  ;;  %v2778_v51 = vld [vmem:[#allocation2 + $0xd0] sm:$0xff]  ;;  %v2761_v57 = vld [vmem:[#allocation2 + $0x48] sm:$0xff] }
  0x18   : > { %753 = vmatpush.bf16.msra.mxu3 %v2781_v11  ;;  %v262_v40 = vrot.slane %v260_v33, 5  ;;  %v249_v42 = vor.u32 %v248_v37, %v245_v36  ;;  %v254_v48 = vrot.slane %v252_v27, 5  ;;  %v268_v53 = vrot.slane %v266_v41, 5  ;;  %v3020_v54 = vld [vmem:[%s2985_s24 + $0x18] sm:$0xf]  ;;  %v2753_v58 = vld [vmem:[#allocation2 + $0x8] sm:$0xff] }
  0x19   : > { %424 = vmatpush.bf16.msra.mxu0 %v2764_v12  ;;  %v235_v38 = vor.u32 %v234_v31, %v231_v30  ;;  %v3023_v56 = vld [vmem:[%s2985_s24 + $0x20] sm:$0xf]  ;;  %v271_v61 = vshrl.u32 %v3020_v54, 16  ;;  %v274_v62 = vshll.u32 %v3020_v54, 16  ;;  %v2769_v63 = vld [vmem:[#allocation2 + $0x88] sm:$0xff]  ;;  %v458_v6 = vunpack.c.l.b16 %v2988_v16  ;;  %v2807_v25 = vld [vmem:[#allocation2 + $0x1b8] sm:$0xff] }
  0x1a   : > { %525 = vmatpush.bf16.msra.mxu1 %v2756_v13  ;;  %v263_v49 = vor.u32 %v262_v40, %v259_v39  ;;  %v250_v52 = vrot.slane %v249_v42, 4  ;;  %v2777_v0 = vld [vmem:[#allocation2 + $0xc8] sm:$0xff]  ;;  %v285_v2 = vshrl.u32 %v3023_v56, 16  ;;  %v288_v3 = vshll.u32 %v3023_v56, 16  ;;  %v2760_v8 = vld [vmem:[#allocation2 + $0x40] sm:$0xff]  ;;  %v2815_v26 = vld [vmem:[#allocation2 + $0x1f8] sm:$0xff] }
  0x1b   : > { %629 = vmatpush.bf16.msra.mxu2 %v2772_v14  ;;  %v236_v46 = vrot.slane %v235_v38, 4  ;;  %v2752_v9 = vld [vmem:[#allocation2] sm:$0xff]  ;;  %v460_v11 = vunpack.c.l.b16 %v3000_v20  ;;  %v273_v12 = vrot.slane %v271_v61, 4  ;;  %v276_v13 = vrot.slane %v274_v62, 5  ;;  %v3041_v21 = vld [vmem:[%s2985_s24 + $0x1c] sm:$0x1] }
  0x1c   : > { %754 = vmatpush.bf16.msra.mxu3 %v2780_v15  ;;  %v264_v55 = vrot.slane %v263_v49, 4  ;;  %v255_v60 = vsel %vm3015_vm2, %v250_v52, %v254_v48  ;;  %v2768_v14 = vld [vmem:[#allocation2 + $0x80] sm:$0xff]  ;;  %v287_v22 = vrot.slane %v285_v2, 4  ;;  %v290_v24 = vrot.slane %v288_v3, 5  ;;  %v2806_v38 = vld [vmem:[#allocation2 + $0x1b0] sm:$0xff]  ;;  %v2805_v49 = vld [vmem:[#allocation2 + $0x1a8] sm:$0xff] }
  0x1d   : > { %425 = vmatpush.bf16.msra.mxu0 %v2763_v28  ;;  %v241_v59 = vsel %vm3015_vm2, %v236_v46, %v240_v47  ;;  %v358_v5 = vunpack.c.l.b16 %v255_v60  ;;  %v2776_v15 = vld [vmem:[#allocation2 + $0xc0] sm:$0xff]  ;;  %v3053_v31 = vpack.c.b16 %v460_v11, %v459_v7  ;;  %v277_v32 = vor.u32 %v276_v13, %v273_v12  ;;  %v2814_v39 = vld [vmem:[#allocation2 + $0x1f0] sm:$0xff]  ;;  %v3059_v40 = vld [vmem:[%s2985_s24 + $0x28] sm:$0xf] }
  0x1e   : > { %526 = vmatpush.bf16.msra.mxu1 %v2755_v29  ;;  %v269_v1 = vsel %vm3015_vm2, %v264_v55, %v268_v53  ;;  %v357_v4 = vunpack.c.l.b16 %v241_v59  ;;  %v3044_v27 = vld [vmem:[%s2985_s24 + $0x24] sm:$0x1]  ;;  %v466_v29 = vpack.c.b16 %v459_v7, %v458_v6  ;;  %v280_v33 = vshll.u32 %v3041_v21, 16  ;;  %v2790_v46 = vld [vmem:[#allocation2 + $0x130] sm:$0xff]  ;;  %v2797_v59 = vld [vmem:[#allocation2 + $0x168] sm:$0xff] }
  0x1f   : > { %630 = vmatpush.bf16.msra.mxu2 %v2771_v34  ;;  %v3037_v10 = vunpack.c.l.b16 %v269_v1  ;;  %v2799_v34 = vld [vmem:[#allocation2 + $0x178] sm:$0xff]  ;;  %v291_v36 = vor.u32 %v290_v24, %v287_v22  ;;  %v294_v37 = vshll.u32 %v3044_v27, 16  ;;  %v278_v41 = vrot.slane %v277_v32, 4  ;;  %v2789_v60 = vld [vmem:[#allocation2 + $0x128] sm:$0xff]  ;;  %v2804_v62 = vld [vmem:[#allocation2 + $0x1a0] sm:$0xff] }
  0x20   : > { %755 = vmatpush.bf16.msra.mxu3 %v2779_v35  ;;  %v3046_v28 = vpack.c.b16 %v358_v5, %v357_v4  ;;  %v2791_v35 = vld [vmem:[#allocation2 + $0x138] sm:$0xff]  ;;  %v282_v42 = vrot.slane %v280_v33, 5  ;;  %v302_v52 = vshll.u32 %v3059_v40, 16  ;;  %v461_v61 = vunpack.c.l.b16 %v3020_v54  ;;  %v3076_v2 = vld [vmem:[%s2985_s24 + $0x2c] sm:$0x1]  ;;  %v2788_v12 = vld [vmem:[#allocation2 + $0x120] sm:$0xff] }
  0x21   : > { %426 = vmatpush.bf16.msra.mxu0 %v2762_v43  ;;  %v3049_v30 = vpack.c.b16 %v3037_v10, %v358_v5  ;;  %v3064_v43 = vld [vmem:[%s2985_s24 + $0x30] sm:$0xf]  ;;  %v292_v47 = vrot.slane %v291_v36, 4  ;;  %v296_v48 = vrot.slane %v294_v37, 5  ;;  %v462_v6 = vunpack.c.l.b16 %v3023_v56  ;;  %v2811_v22 = vld [vmem:[#allocation2 + $0x1d8] sm:$0xff] }
  0x22   : > { %527 = vmatpush.bf16.msra.mxu1 %v2754_v44  ;;  %v2798_v44 = vld [vmem:[#allocation2 + $0x170] sm:$0xff]  ;;  %v313_v53 = vshrl.u32 %v3064_v43, 16  ;;  %v316_v55 = vshll.u32 %v3064_v43, 16  ;;  %v304_v3 = vrot.slane %v302_v52, 5  ;;  %v3086_v13 = vpack.c.b16 %v461_v61, %v460_v11  ;;  %v2795_v33 = vld [vmem:[#allocation2 + $0x158] sm:$0xff]  ;;  %v2809_v52 = vld [vmem:[#allocation2 + $0x1c8] sm:$0xff] }
  0x23   : > { %631 = vmatpush.bf16.msra.mxu2 %v2770_v50  ;;  %v2813_v50 = vld [vmem:[#allocation2 + $0x1e8] sm:$0xff]  ;;  %v3095_v32 = vpack.c.b16 %v462_v6, %v461_v61 }
  0x24   : > { %756 = vmatpush.bf16.msra.mxu3 %v2778_v51  ;;  %v299_v51 = vshrl.u32 %v3059_v40, 16  ;;  %v315_v4 = vrot.slane %v313_v53, 4  ;;  %v318_v5 = vrot.slane %v316_v55, 5 }
  0x25   : > { %427 = vmatpush.bf16.msra.mxu0 %v2761_v57  ;;  %v283_v57 = vsel %vm3015_vm2, %v278_v41, %v282_v42  ;;  %v2794_v41 = vld [vmem:[#allocation2 + $0x150] sm:$0xff]  ;;  %v3105_v42 = vld [vmem:[%s2985_s24 + $0x38] sm:$0xf] }
  0x26   : > { %528 = vmatpush.bf16.msra.mxu1 %v2753_v58  ;;  %v297_v58 = vsel %vm3015_vm2, %v292_v47, %v296_v48  ;;  %v360_v1 = vunpack.c.l.b16 %v283_v57  ;;  %v3109_v47 = vld [vmem:[%s2985_s24 + $0x40] sm:$0xf]  ;;  %v837_v48 = vrot.slane %v2991_v17, 5 }
  0x27   : > { %632 = vmatpush.bf16.msra.mxu2 %v2769_v63  ;;  %v2812_v63 = vld [vmem:[#allocation2 + $0x1e0] sm:$0xff]  ;;  %v3079_v7 = vunpack.c.l.b16 %v297_v58  ;;  %v667_v61 = vshll.u32 %v3109_v47, 16 }
  0x28   : > { %757 = vmatpush.bf16.msra.mxu3 %v2777_v0  ;;  %v301_v0 = vrot.slane %v299_v51, 4  ;;  %v3090_v24 = vpack.c.b16 %v360_v1, %v3037_v10  ;;  %v2802_v10 = vld [vmem:[#allocation2 + $0x190] sm:$0xff]  ;;  %v2801_v51 = vld [vmem:[#allocation2 + $0x188] sm:$0xff] }
  0x29   : > { %428 = vmatpush.bf16.msra.mxu0 %v2760_v8  ;;  %v3082_v8 = vld [vmem:[%s2985_s24 + $0x34] sm:$0x1]  ;;  %v3098_v11 = vpack.c.b16 %v3079_v7, %v360_v1  ;;  %v2808_v1 = vld [vmem:[#allocation2 + $0x1c0] sm:$0xff] }
  0x2a   : > { %529 = vmatpush.bf16.msra.mxu1 %v2752_v9  ;;  %v2796_v9 = vld [vmem:[#allocation2 + $0x160] sm:$0xff] }
  0x2b   : > { %633 = vmatpush.bf16.msra.mxu2 %v2768_v14  ;;  %v308_v14 = vshll.u32 %v3076_v2, 16 }
  0x2c   : > { %758 = vmatpush.bf16.msra.mxu3 %v2776_v15  ;;  %429 = vmatmul.bf16.vlgmr.msra.gmra.mxu0 %v3046_v28  ;;  %v2803_v15 = vld [vmem:[#allocation2 + $0x198] sm:$0xff] }
  0x2d   : > { %530 = vmatmul.bf16.vlgmr.msra.gmra.mxu1 %v466_v29  ;;  %948 = vmatpush.bf16.msrb.mxu0 %v2799_v34  ;;  %v322_v29 = vshll.u32 %v3082_v8, 16  ;;  %v2787_v34 = vld [vmem:[#allocation2 + $0x118] sm:$0xff]  ;;  %v310_v37 = vrot.slane %v308_v14, 5 }
  0x2e   : > { %634 = vmatmul.bf16.vlgmr.msra.gmra.mxu2 %v3053_v31  ;;  %1025 = vmatpush.bf16.msrb.mxu1 %v2791_v35  ;;  %v2810_v35 = vld [vmem:[#allocation2 + $0x1d0] sm:$0xff]  ;;  %v3137_v14 = vld [vmem:[%s2985_s24 + $0x3c] sm:$0x1] }
  0x2f   : > { %1119 = vmatpush.bf16.msrb.mxu2 %v2807_v25  ;;  %759 = vmatmul.bf16.vlgmr.msra.gmra.mxu3 %v3049_v30  ;;  %v305_v25 = vor.u32 %v304_v3, %v301_v0  ;;  %v2800_v0 = vld [vmem:[#allocation2 + $0x180] sm:$0xff] }
  0x30   : > { %1235 = vmatpush.bf16.msrb.mxu3 %v2815_v26  ;;  %v319_v26 = vor.u32 %v318_v5, %v315_v4  ;;  %v463_v5 = vunpack.c.l.b16 %v3059_v40 }
  0x31   : > { %949 = vmatpush.bf16.msrb.mxu0 %v2798_v44  ;;  %v306_v36 = vrot.slane %v305_v25, 4  ;;  %v2339_v44 = vrot.slane %v2988_v16, 9 }
  0x32   : > { %1026 = vmatpush.bf16.msrb.mxu1 %v2790_v46  ;;  %v2786_v46 = vld [vmem:[#allocation2 + $0x110] sm:$0xff] }
  0x33   : > { %1120 = vmatpush.bf16.msrb.mxu2 %v2806_v38  ;;  %v320_v38 = vrot.slane %v319_v26, 4  ;;  %v311_v16 = vsel %vm3015_vm2, %v306_v36, %v310_v37  ;;  %v838_v55 = vsel %vm3114_vm5, %v2339_v44, %v837_v48  ;;  %v669_v26 = vrot.slane %v667_v61, 5  ;;  %v2822_v61 = vld [vmem:[#allocation2 + $0x230] sm:$0xff] }
  0x34   : > { %1236 = vmatpush.bf16.msrb.mxu3 %v2814_v39  ;;  %v324_v39 = vrot.slane %v322_v29, 5  ;;  %v884_v57 = vunpack.c.l.b16 %v838_v55  ;;  %v362_v4 = vunpack.c.l.b16 %v311_v16  ;;  %v2792_v29 = vld [vmem:[#allocation2 + $0x140] sm:$0xff]  ;;  %v3149_v37 = vpack.c.b16 %v463_v5, %v462_v6 }
  0x35   : > { %950 = vmatpush.bf16.msrb.mxu0 %v2797_v59  ;;  %v2342_v16 = vrot.slane %v3020_v54, 9  ;;  %v849_v55 = vrot.slane %v3041_v21, 5 }
  0x36   : > { %1027 = vmatpush.bf16.msrb.mxu1 %v2789_v60  ;;  %v325_v59 = vsel %vm3015_vm2, %v320_v38, %v324_v39  ;;  %v664_v60 = vshrl.u32 %v3109_v47, 16  ;;  %v3145_v36 = vpack.c.b16 %v362_v4, %v3079_v7  ;;  %v336_v38 = vshll.u32 %v3137_v14, 16 }
  0x37   : > { %1121 = vmatpush.bf16.msrb.mxu2 %v2805_v49  ;;  %v2340_v49 = vrot.slane %v2994_v18, 9  ;;  %v327_v18 = vshrl.u32 %v3105_v42, 16 }
  0x38   : > { %1237 = vmatpush.bf16.msrb.mxu3 %v2813_v50  ;;  %v841_v50 = vrot.slane %v2997_v19, 5  ;;  %v330_v19 = vshll.u32 %v3105_v42, 16  ;;  %v666_v25 = vrot.slane %v664_v60, 4  ;;  %v338_v48 = vrot.slane %v336_v38, 5  ;;  %v2830_v60 = vld [vmem:[#allocation2 + $0x270] sm:$0xff] }
  0x39   : > { %951 = vmatpush.bf16.msrb.mxu0 %v2796_v9  ;;  %v464_v9 = vunpack.c.l.b16 %v3064_v43  ;;  %v2344_v38 = vrot.slane %v3059_v40, 9  ;;  %v2345_v40 = vrot.slane %v3064_v43, 9  ;;  %v2346_v43 = vrot.slane %v3105_v42, 9 }
  0x3a   : > { %1028 = vmatpush.bf16.msrb.mxu1 %v2788_v12  ;;  %v842_v17 = vsel %vm3114_vm5, %v2340_v49, %v841_v50  ;;  %v3134_v12 = vunpack.c.l.b16 %v325_v59  ;;  %v670_v7 = vor.u32 %v669_v26, %v666_v25  ;;  %v2839_v50 = vld [vmem:[#allocation2 + $0x2b8] sm:$0xff]  ;;  %v850_v59 = vsel %vm3114_vm5, %v2342_v16, %v849_v55 }
  0x3b   : > { %1122 = vmatpush.bf16.msrb.mxu2 %v2804_v62  ;;  %v885_v58 = vunpack.c.l.b16 %v842_v17  ;;  %v2793_v62 = vld [vmem:[#allocation2 + $0x148] sm:$0xff] }
  0x3c   : > { %1238 = vmatpush.bf16.msrb.mxu3 %v2812_v63  ;;  %434 = vmatmul.bf16.gmra.mxu0 %v3090_v24  ;;  %v2785_v63 = vld [vmem:[#allocation2 + $0x108] sm:$0xff]  ;;  %v671_v17 = vrot.slane %v670_v7, 4  ;;  %v2844_v7 = vld [vmem:[#allocation2 + $0x2e0] sm:$0xff] }
  0x3d   : > { %535 = vmatmul.bf16.gmra.mxu1 %v3086_v13  ;;  %952 = vmatpush.bf16.msrb.mxu0 %v2795_v33  ;;  %v3130_v3 = vpack.c.b16 %v885_v58, %v884_v57  ;;  %v2784_v33 = vld [vmem:[#allocation2 + $0x100] sm:$0xff]  ;;  %v2838_v57 = vld [vmem:[#allocation2 + $0x2b0] sm:$0xff] }
  0x3e   : > { %639 = vmatmul.bf16.gmra.mxu2 %v3095_v32  ;;  %1029 = vmatpush.bf16.msrb.mxu1 %v2787_v34  ;;  %v2341_v34 = vrot.slane %v3000_v20, 9  ;;  %v3156_v20 = vpack.c.b16 %v464_v9, %v463_v5 }
  0x3f   : > { %1123 = vmatpush.bf16.msrb.mxu2 %v2803_v15  ;;  %764 = vmatmul.bf16.gmra.mxu3 %v3098_v11  ;;  %v329_v15 = vrot.slane %v327_v18, 4 }
  0x40   : > { %1239 = vmatpush.bf16.msrb.mxu3 %v2811_v22  ;;  %v332_v22 = vrot.slane %v330_v19, 5  ;;  %v2823_v19 = vld [vmem:[#allocation2 + $0x238] sm:$0xff] }
  0x41   : > { %953 = vmatpush.bf16.msrb.mxu0 %v2794_v41 }
  0x42   : > { %1030 = vmatpush.bf16.msrb.mxu1 %v2786_v46  ;;  %v333_v41 = vor.u32 %v332_v22, %v329_v15  ;;  %v2343_v15 = vrot.slane %v3023_v56, 9  ;;  %v853_v22 = vrot.slane %v3044_v27, 5  ;;  %v2837_v27 = vld [vmem:[#allocation2 + $0x2a8] sm:$0xff] }
  0x43   : > { %1124 = vmatpush.bf16.msrb.mxu2 %v2802_v10  ;;  %v845_v10 = vrot.slane %v3005_v23, 5  ;;  %v3159_v23 = vpack.c.b16 %v3134_v12, %v362_v4  ;;  %v569_v4 = vunpack.c.l.b16 %v3109_v47 }
  0x44   : > { %1240 = vmatpush.bf16.msrb.mxu3 %v2810_v35  ;;  %v3142_v35 = vld [vmem:[%s2985_s24 + $0x44] sm:$0x1]  ;;  %v334_v49 = vrot.slane %v333_v41, 4  ;;  %v2821_v41 = vld [vmem:[#allocation2 + $0x228] sm:$0xff] }
  0x45   : > { %954 = vmatpush.bf16.msrb.mxu0 %v2793_v62  ;;  %v846_v39 = vsel %vm3114_vm5, %v2341_v34, %v845_v10  ;;  %v673_v46 = vshll.u32 %v3142_v35, 16  ;;  %v887_v62 = vunpack.c.l.b16 %v850_v59  ;;  %v2842_v59 = vld [vmem:[#allocation2 + $0x2d0] sm:$0xff] }
  0x46   : > { %1031 = vmatpush.bf16.msrb.mxu1 %v2785_v63  ;;  %v886_v44 = vunpack.c.l.b16 %v846_v39  ;;  %v339_v54 = vsel %vm3015_vm2, %v334_v49, %v338_v48  ;;  %v857_v39 = vrot.slane %v3076_v2, 5  ;;  %v2828_v48 = vld [vmem:[#allocation2 + $0x260] sm:$0xff]  ;;  %v861_v2 = vrot.slane %v3082_v8, 5 }
  0x47   : > { %1125 = vmatpush.bf16.msrb.mxu2 %v2801_v51  ;;  %v2847_v51 = vld [vmem:[#allocation2 + $0x2f8] sm:$0xff]  ;;  %v675_v18 = vrot.slane %v673_v46, 5  ;;  %v2820_v49 = vld [vmem:[#allocation2 + $0x220] sm:$0xff]  ;;  %v865_v8 = vrot.slane %v3137_v14, 5  ;;  %v2841_v14 = vld [vmem:[#allocation2 + $0x2c8] sm:$0xff] }
  0x48   : > { %1241 = vmatpush.bf16.msrb.mxu3 %v2809_v52  ;;  %v3162_v6 = vpack.c.b16 %v886_v44, %v885_v58  ;;  %v2831_v52 = vld [vmem:[#allocation2 + $0x278] sm:$0xff]  ;;  %v2846_v58 = vld [vmem:[#allocation2 + $0x2f0] sm:$0xff]  ;;  %v3176_v63 = vpack.c.b16 %v887_v62, %v886_v44  ;;  %v2836_v44 = vld [vmem:[#allocation2 + $0x2a0] sm:$0xff]  ;;  %v858_v46 = vsel %vm3114_vm5, %v2344_v38, %v857_v39 }
  0x49   : > { %955 = vmatpush.bf16.msrb.mxu0 %v2792_v29  ;;  %v676_v21 = vsel %vm3015_vm2, %v671_v17, %v675_v18  ;;  %v854_v29 = vsel %vm3114_vm5, %v2343_v15, %v853_v22  ;;  %v2835_v17 = vld [vmem:[#allocation2 + $0x298] sm:$0xff]  ;;  %v2824_v15 = vld [vmem:[#allocation2 + $0x240] sm:$0xff] }
  0x4a   : > { %1032 = vmatpush.bf16.msrb.mxu1 %v2784_v33  ;;  %v3180_v5 = vunpack.c.l.b16 %v676_v21  ;;  %v888_v56 = vunpack.c.l.b16 %v854_v29  ;;  %v2843_v18 = vld [vmem:[#allocation2 + $0x2d8] sm:$0xff]  ;;  %v2817_v21 = vld [vmem:[#allocation2 + $0x208] sm:$0xff]  ;;  %v2816_v22 = vld [vmem:[#allocation2 + $0x200] sm:$0xff] }
  0x4b   : > { %1126 = vmatpush.bf16.msrb.mxu2 %v2800_v0  ;;  %v364_v0 = vunpack.c.l.b16 %v339_v54  ;;  %v2825_v54 = vld [vmem:[#allocation2 + $0x248] sm:$0xff]  ;;  %v2871_v29 = vld [vmem:[#allocation2 + $0x3b8] sm:$0xff] }
  0x4c   : > { %1242 = vmatpush.bf16.msrb.mxu3 %v2808_v1  ;;  %439 = vmatmul.bf16.gmra.mxu0 %v3145_v36  ;;  %v465_v1 = vunpack.c.l.b16 %v3105_v42  ;;  %v3200_v10 = vpack.c.b16 %v888_v56, %v887_v62  ;;  %v2833_v42 = vld [vmem:[#allocation2 + $0x288] sm:$0xff]  ;;  %v2863_v39 = vld [vmem:[#allocation2 + $0x378] sm:$0xff] }
  0x4d   : > { %540 = vmatmul.bf16.gmra.mxu1 %v3149_v37  ;;  %1370 = vmatpush.bf16.msra.mxu0 %v2831_v52  ;;  %v3185_v25 = vpack.c.b16 %v364_v0, %v3134_v12  ;;  %v3198_v34 = vpack.c.b16 %v3180_v5, %v364_v0  ;;  %v2829_v12 = vld [vmem:[#allocation2 + $0x268] sm:$0xff]  ;;  %v862_v52 = vsel %vm3114_vm5, %v2345_v40, %v861_v2  ;;  %v2832_v0 = vld [vmem:[#allocation2 + $0x280] sm:$0xff] }
  0x4e   : > { %644 = vmatmul.bf16.gmra.mxu2 %v3156_v20  ;;  %1447 = vmatpush.bf16.msra.mxu1 %v2823_v19  ;;  %v3189_v26 = vpack.c.b16 %v465_v1, %v464_v9  ;;  %v3195_v33 = vpack.c.b16 %v569_v4, %v465_v1  ;;  %v2845_v9 = vld [vmem:[#allocation2 + $0x2e8] sm:$0xff]  ;;  %v890_v16 = vunpack.c.l.b16 %v862_v52  ;;  %v2827_v19 = vld [vmem:[#allocation2 + $0x258] sm:$0xff]  ;;  %v2840_v1 = vld [vmem:[#allocation2 + $0x2c0] sm:$0xff] }
  0x4f   : > { %769 = vmatmul.bf16.gmra.mxu3 %v3159_v23  ;;  %1545 = vmatpush.bf16.msra.mxu2 %v2839_v50  ;;  %v889_v50 = vunpack.c.l.b16 %v858_v46  ;;  %v2861_v40 = vld [vmem:[#allocation2 + $0x368] sm:$0xff]  ;;  %v2868_v52 = vld [vmem:[#allocation2 + $0x3a0] sm:$0xff] }
  0x50   : > { %1664 = vmatpush.bf16.msra.mxu3 %v2847_v51  ;;  %v2853_v2 = vld [vmem:[#allocation2 + $0x328] sm:$0xff] }
  0x51   : > { %1371 = vmatpush.bf16.msra.mxu0 %v2830_v60  ;;  %v3210_v51 = vpack.c.b16 %v889_v50, %v888_v56  ;;  %v3216_v55 = vpack.c.b16 %v890_v16, %v889_v50  ;;  %v2818_v60 = vld [vmem:[#allocation2 + $0x210] sm:$0xff]  ;;  %v2879_v56 = vld [vmem:[#allocation2 + $0x3f8] sm:$0xff]  ;;  %v2877_v50 = vld [vmem:[#allocation2 + $0x3e8] sm:$0xff] }
  0x52   : > { %1448 = vmatpush.bf16.msra.mxu1 %v2822_v61 }
  0x53   : > { %1546 = vmatpush.bf16.msra.mxu2 %v2838_v57  ;;  %v2819_v57 = vld [vmem:[#allocation2 + $0x218] sm:$0xff] }
  0x54   : > { %1665 = vmatpush.bf16.msra.mxu3 %v2846_v58  ;;  %v2834_v58 = vld [vmem:[#allocation2 + $0x290] sm:$0xff] }
  0x55   : > { %1372 = vmatpush.bf16.msra.mxu0 %v2829_v12 }
  0x56   : > { %1449 = vmatpush.bf16.msra.mxu1 %v2821_v41  ;;  %v2855_v41 = vld [vmem:[#allocation2 + $0x338] sm:$0xff] }
  0x57   : > { %1547 = vmatpush.bf16.msra.mxu2 %v2837_v27  ;;  %v2443_v27 = vrot.slane %v3109_v47, 9 }
  0x58   : > { %1666 = vmatpush.bf16.msra.mxu3 %v2845_v9  ;;  %v1159_v9 = vrot.slane %v3142_v35, 5  ;;  %v2862_v35 = vld [vmem:[#allocation2 + $0x370] sm:$0xff] }
  0x59   : > { %1373 = vmatpush.bf16.msra.mxu0 %v2828_v48  ;;  %v2854_v48 = vld [vmem:[#allocation2 + $0x330] sm:$0xff] }
  0x5a   : > { %1450 = vmatpush.bf16.msra.mxu1 %v2820_v49  ;;  %v3240_v12 = vsel %vm3114_vm5, %v2443_v27, %v1159_v9  ;;  %v2869_v49 = vld [vmem:[#allocation2 + $0x3a8] sm:$0xff] }
  0x5b   : > { %1548 = vmatpush.bf16.msra.mxu2 %v2836_v44  ;;  %v1178_v38 = vunpack.c.l.b16 %v3240_v12  ;;  %v2870_v44 = vld [vmem:[#allocation2 + $0x3b0] sm:$0xff] }
  0x5c   : > { %444 = vmatmul.bf16.gmra.mxu0 %v3185_v25  ;;  %1667 = vmatpush.bf16.msra.mxu3 %v2844_v7  ;;  %v2878_v7 = vld [vmem:[#allocation2 + $0x3f0] sm:$0xff] }
  0x5d   : > { %545 = vmatmul.bf16.gmra.mxu1 %v3189_v26  ;;  %1374 = vmatpush.bf16.msra.mxu0 %v2827_v19 }
  0x5e   : > { %649 = vmatmul.bf16.gmra.mxu2 %v3195_v33  ;;  %1451 = vmatpush.bf16.msra.mxu1 %v2819_v57  ;;  %v2867_v57 = vld [vmem:[#allocation2 + $0x398] sm:$0xff] }
  0x5f   : > { %774 = vmatmul.bf16.gmra.mxu3 %v3198_v34  ;;  %1549 = vmatpush.bf16.msra.mxu2 %v2835_v17 }
  0x60   : > { %1668 = vmatpush.bf16.msra.mxu3 %v2843_v18 }
  0x62   : > { %1452 = vmatpush.bf16.msra.mxu1 %v2818_v60  ;;  %v3259_v60 = vld [vmem:[%s3384_s2] ss:$0 sm:$0xff] }
  0x63   : > { %1550 = vmatpush.bf16.msra.mxu2 %v2834_v58 }
  0x64   : > { %1669 = vmatpush.bf16.msra.mxu3 %v2842_v59 }
  0x66   : > { %1453 = vmatpush.bf16.msra.mxu1 %v2817_v21  ;;  %v2851_v21 = vld [vmem:[#allocation2 + $0x318] sm:$0xff] }
  0x67   : > { %1551 = vmatpush.bf16.msra.mxu2 %v2833_v42 }
  0x68   : > { %1670 = vmatpush.bf16.msra.mxu3 %v2841_v14 }
  0x6a   : > { %1454 = vmatpush.bf16.msra.mxu1 %v2816_v22  ;;  %v2874_v22 = vld [vmem:[#allocation2 + $0x3d0] sm:$0xff] }
  0x6b   : > { %1552 = vmatpush.bf16.msra.mxu2 %v2832_v0  ;;  %v2866_v0 = vld [vmem:[#allocation2 + $0x390] sm:$0xff] }
  0x6c   : > { %956 = vmatmul.bf16.vlgmr.msrb.gmra.mxu0 %v3130_v3  ;;  %v866_v3 = vsel %vm3114_vm5, %v2346_v43, %v865_v8  ;;  %1671 = vmatpush.bf16.msra.mxu3 %v2840_v1  ;;  %v2860_v43 = vld [vmem:[#allocation2 + $0x360] sm:$0xff] }
  0x6d   : > { %1033 = vmatmul.bf16.vlgmr.msrb.gmra.mxu1 %v3046_v28  ;;  %v2826_v28 = vld [vmem:[#allocation2 + $0x250] sm:$0xff]  ;;  %v891_v61 = vunpack.c.l.b16 %v866_v3  ;;  %v2852_v8 = vld [vmem:[#allocation2 + $0x320] sm:$0xff]  ;;  %v2875_v3 = vld [vmem:[#allocation2 + $0x3d8] sm:$0xff] }
  0x6e   : > { %1127 = vmatmul.bf16.vlgmr.msrb.gmra.mxu2 %v3049_v30  ;;  %1375 = vmatpush.bf16.msra.mxu0 %v2826_v28 }
  0x6f   : > { %1243 = vmatmul.bf16.vlgmr.msrb.gmra.mxu3 %v3162_v6  ;;  %v3226_v62 = vpack.c.b16 %v891_v61, %v890_v16  ;;  %1971 = vmatpush.bf16.msrb.mxu2 %v2871_v29  ;;  %v3245_v46 = vpack.c.b16 %v1178_v38, %v891_v61  ;;  %v2876_v16 = vld [vmem:[#allocation2 + $0x3e0] sm:$0xff] }
  0x70   : > { %2081 = vmatpush.bf16.msrb.mxu3 %v2879_v56  ;;  %1877 = vmatpush.bf16.msrb.mxu1 %v2855_v41 }
  0x72   : > { %1376 = vmatpush.bf16.msra.mxu0 %v2825_v54  ;;  %v2859_v54 = vld [vmem:[#allocation2 + $0x358] sm:$0xff] }
  0x73   : > { %1972 = vmatpush.bf16.msrb.mxu2 %v2870_v44  ;;  %v3274_v44 = vld [vmem:[%s2985_s24 + $0x48] sm:$0xf] }
  0x74   : > { %2082 = vmatpush.bf16.msrb.mxu3 %v2878_v7  ;;  %1878 = vmatpush.bf16.msrb.mxu1 %v2854_v48  ;;  %v2858_v7 = vld [vmem:[#allocation2 + $0x350] sm:$0xff]  ;;  %v2865_v48 = vld [vmem:[#allocation2 + $0x388] sm:$0xff] }
  0x76   : > { %1377 = vmatpush.bf16.msra.mxu0 %v2824_v15 }
  0x77   : > { %1973 = vmatpush.bf16.msrb.mxu2 %v2869_v49 }
  0x78   : > { %2083 = vmatpush.bf16.msrb.mxu3 %v2877_v50  ;;  %1879 = vmatpush.bf16.msrb.mxu1 %v2853_v2 }
  0x7a   : > { %1800 = vmatpush.bf16.msrb.mxu0 %v2863_v39 }
  0x7b   : > { %1974 = vmatpush.bf16.msrb.mxu2 %v2868_v52 }
  0x7c   : > { %961 = vmatmul.bf16.gmra.mxu0 %v3176_v63  ;;  %2084 = vmatpush.bf16.msrb.mxu3 %v2876_v16  ;;  %v1586_v16 = vshll.u32 %v3274_v44, 16 }
  0x7d   : > { %1038 = vmatmul.bf16.gmra.mxu1 %v3090_v24 }
  0x7e   : > { %1132 = vmatmul.bf16.gmra.mxu2 %v3098_v11  ;;  %1801 = vmatpush.bf16.msrb.mxu0 %v2862_v35  ;;  %v2850_v35 = vld [vmem:[#allocation2 + $0x310] sm:$0xff] }
  0x7f   : > { %1248 = vmatmul.bf16.gmra.mxu3 %v3200_v10  ;;  %1880 = vmatpush.bf16.msrb.mxu1 %v2852_v8 }
  0x80   : > { %1975 = vmatpush.bf16.msrb.mxu2 %v2867_v57  ;;  %2085 = vmatpush.bf16.msrb.mxu3 %v2875_v3  ;;  %v1588_v57 = vrot.slane %v1586_v16, 5  ;;  %v2864_v3 = vld [vmem:[#allocation2 + $0x380] sm:$0xff] }
  0x82   : > { %1802 = vmatpush.bf16.msrb.mxu0 %v2861_v40  ;;  %v2873_v40 = vld [vmem:[#allocation2 + $0x3c8] sm:$0xff] }
  0x83   : > { %1881 = vmatpush.bf16.msrb.mxu1 %v2851_v21 }
  0x84   : > { %1976 = vmatpush.bf16.msrb.mxu2 %v2866_v0  ;;  %2086 = vmatpush.bf16.msrb.mxu3 %v2874_v22 }
  0x86   : > { %1803 = vmatpush.bf16.msrb.mxu0 %v2860_v43 }
  0x87   : > { %1882 = vmatpush.bf16.msrb.mxu1 %v2850_v35 }
  0x88   : > { %1977 = vmatpush.bf16.msrb.mxu2 %v2865_v48  ;;  %2087 = vmatpush.bf16.msrb.mxu3 %v2873_v40 }
  0x8a   : > { %1804 = vmatpush.bf16.msrb.mxu0 %v2859_v54 }
  0x8c   : > { %966 = vmatmul.bf16.gmra.mxu0 %v3210_v51  ;;  %1978 = vmatpush.bf16.msrb.mxu2 %v2864_v3 }
  0x8d   : > { %1043 = vmatmul.bf16.gmra.mxu1 %v3145_v36 }
  0x8e   : > { %1137 = vmatmul.bf16.gmra.mxu2 %v3159_v23  ;;  %1805 = vmatpush.bf16.msrb.mxu0 %v2858_v7 }
  0x8f   : > { %1253 = vmatmul.bf16.gmra.mxu3 %v3216_v55 }
  0x9c   : > { %971 = vmatmul.bf16.gmra.mxu0 %v3226_v62 }
  0x9d   : > { %1048 = vmatmul.bf16.gmra.mxu1 %v3185_v25 }
  0x9e   : > { %1142 = vmatmul.bf16.gmra.mxu2 %v3198_v34 }
  0x9f   : > { %1258 = vmatmul.bf16.gmra.mxu3 %v3245_v46 }
  0xa9   : > { %v430_v17 = vpop.f32.mrf.mxu0 }
  0xaa   : > { %v531_v18 = vpop.f32.mrf.mxu1 }
  0xab   : > { %v532_v19 = vadd.f32 %v531_v18, %v430_v17  ;;  %v2857_v18 = vld [vmem:[#allocation2 + $0x348] sm:$0xff] }
  0xac   : > { %1378 = vmatmul.bf16.vlgmr.msra.gmra.mxu0 %v3049_v30 }
  0xad   : > { %1455 = vmatmul.bf16.vlgmr.msra.gmra.mxu1 %v3053_v31  ;;  %1806 = vmatpush.bf16.msrb.mxu0 %v2857_v18 }
  0xae   : > { %1553 = vmatmul.bf16.vlgmr.msra.gmra.mxu2 %v3086_v13 }
  0xaf   : > { %1672 = vmatmul.bf16.vlgmr.msra.gmra.mxu3 %v3090_v24 }
  0xb1   : > { %v635_v58 = vpop.f32.mrf.mxu2  ;;  %v432_v61 = vpop.f32.mrf.mxu0 }
  0xb2   : > { %v760_v59 = vpop.f32.mrf.mxu3  ;;  %v655_v28 = vadd.f32 %v635_v58, %v532_v19  ;;  %v533_v31 = vpop.f32.mrf.mxu1  ;;  %v2849_v19 = vld [vmem:[#allocation2 + $0x308] sm:$0xff] }
  0xb3   : > { %v534_v14 = vadd.f32 %v533_v31, %v432_v61  ;;  %1883 = vmatpush.bf16.msrb.mxu1 %v2849_v19 }
  0xb4   : > { %v780_v13 = vadd.f32 %v760_v59, %v655_v28  ;;  %v3282_v59 = vld [vmem:[%s2985_s24 + $0x4c] sm:$0x1]  ;;  %v2872_v28 = vld [vmem:[#allocation2 + $0x3c0] sm:$0xff] }
  0xb5   : > { %2088 = vmatpush.bf16.msrb.mxu3 %v2872_v28 }
  0xb6   : > { %v791_v42 = vadd.f32 %v3259_v60, %v780_v13  ;;  %v2856_v13 = vld [vmem:[#allocation2 + $0x340] sm:$0xff] }
  0xb7   : > { %1807 = vmatpush.bf16.msrb.mxu0 %v2856_v13 }
  0xb8   : > { %799 = vst [vmem:[%s3264_s30] sm:$0xff] %v791_v42  ;;  %v2848_v42 = vld [vmem:[#allocation2 + $0x300] sm:$0xff] }
  0xb9   : > { %v637_v1 = vpop.f32.mrf.mxu2  ;;  %v435_v56 = vpop.f32.mrf.mxu0  ;;  %1884 = vmatpush.bf16.msrb.mxu1 %v2848_v42 }
  0xba   : > { %v762_v15 = vpop.f32.mrf.mxu3  ;;  %v656_v29 = vadd.f32 %v637_v1, %v534_v14  ;;  %v536_v27 = vpop.f32.mrf.mxu1  ;;  %v1592_v1 = vshll.u32 %v3282_v59, 16 }
  0xbb   : > { %v537_v41 = vadd.f32 %v536_v27, %v435_v56 }
  0xbc   : > { %v781_v9 = vadd.f32 %v762_v15, %v656_v29  ;;  %1383 = vmatmul.bf16.gmra.mxu0 %v3098_v11  ;;  %v1594_v27 = vrot.slane %v1592_v1, 5 }
  0xbd   : > { %1460 = vmatmul.bf16.gmra.mxu1 %v3095_v32 }
  0xbe   : > { %v792_v39 = vadd.f32 %v3259_v60, %v781_v9  ;;  %1558 = vmatmul.bf16.gmra.mxu2 %v3149_v37  ;;  %v1583_v37 = vshrl.u32 %v3274_v44, 16 }
  0xbf   : > { %1677 = vmatmul.bf16.gmra.mxu3 %v3145_v36 }
  0xc0   : > { %800 = vst [vmem:[%s3264_s30 + $0x20] sm:$0xff] %v792_v39  ;;  %v1585_v8 = vrot.slane %v1583_v37, 4 }
  0xc1   : > { %v640_v49 = vpop.f32.mrf.mxu2  ;;  %v437_v52 = vpop.f32.mrf.mxu0 }
  0xc2   : > { %v765_v50 = vpop.f32.mrf.mxu3  ;;  %v657_v2 = vadd.f32 %v640_v49, %v537_v41  ;;  %v538_v32 = vpop.f32.mrf.mxu1  ;;  %v1589_v0 = vor.u32 %v1588_v57, %v1585_v8 }
  0xc3   : > { %v539_v58 = vadd.f32 %v538_v32, %v437_v52 }
  0xc4   : > { %v782_v17 = vadd.f32 %v765_v50, %v657_v2  ;;  %v1590_v56 = vrot.slane %v1589_v0, 4  ;;  %v1494_v50 = vunpack.c.l.b16 %v3274_v44 }
  0xc6   : > { %v793_v43 = vadd.f32 %v3259_v60, %v782_v17  ;;  %v1595_v48 = vsel %vm3015_vm2, %v1590_v56, %v1594_v27  ;;  %v1495_v17 = vpack.c.b16 %v1494_v50, %v569_v4 }
  0xc7   : > { %v1613_v40 = vunpack.c.l.b16 %v1595_v48 }
  0xc8   : > { %801 = vst [vmem:[%s3264_s30 + $0x40] sm:$0xff] %v793_v43 }
  0xc9   : > { %v642_v61 = vpop.f32.mrf.mxu2  ;;  %v440_v54 = vpop.f32.mrf.mxu0  ;;  %v3299_v45 = vpack.c.b16 %v1613_v40, %v3180_v5 }
  0xca   : > { %v767_v31 = vpop.f32.mrf.mxu3  ;;  %v658_v14 = vadd.f32 %v642_v61, %v539_v58  ;;  %v541_v21 = vpop.f32.mrf.mxu1 }
  0xcb   : > { %v542_v29 = vadd.f32 %v541_v21, %v440_v54 }
  0xcc   : > { %v783_v15 = vadd.f32 %v767_v31, %v658_v14  ;;  %1388 = vmatmul.bf16.gmra.mxu0 %v3159_v23 }
  0xcd   : > { %1465 = vmatmul.bf16.gmra.mxu1 %v3156_v20 }
  0xce   : > { %v794_v22 = vadd.f32 %v3259_v60, %v783_v15  ;;  %1563 = vmatmul.bf16.gmra.mxu2 %v3189_v26 }
  0xcf   : > { %1682 = vmatmul.bf16.gmra.mxu3 %v3185_v25 }
  0xd0   : > { %802 = vst [vmem:[%s3264_s30 + $0x60] sm:$0xff] %v794_v22 }
  0xd1   : > { %v645_v9 = vpop.f32.mrf.mxu2  ;;  %v442_v7 = vpop.f32.mrf.mxu0 }
  0xd2   : > { %v770_v39 = vpop.f32.mrf.mxu3  ;;  %v659_v41 = vadd.f32 %v645_v9, %v542_v29  ;;  %v543_v35 = vpop.f32.mrf.mxu1 }
  0xd3   : > { %v544_v26 = vadd.f32 %v543_v35, %v442_v7 }
  0xd4   : > { %v784_v20 = vadd.f32 %v770_v39, %v659_v41 }
  0xd6   : > { %v795_v49 = vadd.f32 %v3259_v60, %v784_v20 }
  0xd8   : > { %803 = vst [vmem:[%s3264_s30 + $0x80] sm:$0xff] %v795_v49 }
  0xd9   : > { %v647_v2 = vpop.f32.mrf.mxu2  ;;  %v445_v37 = vpop.f32.mrf.mxu0 }
  0xda   : > { %v772_v52 = vpop.f32.mrf.mxu3  ;;  %v660_v32 = vadd.f32 %v647_v2, %v544_v26  ;;  %v546_v16 = vpop.f32.mrf.mxu1 }
  0xdb   : > { %v547_v43 = vadd.f32 %v546_v16, %v445_v37 }
  0xdc   : > { %v785_v18 = vadd.f32 %v772_v52, %v660_v32  ;;  %1393 = vmatmul.bf16.gmra.mxu0 %v3198_v34 }
  0xdd   : > { %1470 = vmatmul.bf16.gmra.mxu1 %v3195_v33 }
  0xde   : > { %v796_v19 = vadd.f32 %v3259_v60, %v785_v18  ;;  %1568 = vmatmul.bf16.gmra.mxu2 %v1495_v17  ;;  %v2708_v18 = vrot.slane %v3274_v44, 9 }
  0xdf   : > { %1687 = vmatmul.bf16.gmra.mxu3 %v3299_v45 }
  0xe0   : > { %804 = vst [vmem:[%s3264_s30 + $0xa0] sm:$0xff] %v796_v19  ;;  %v2011_v19 = vrot.slane %v3282_v59, 5 }
  0xe1   : > { %v650_v8 = vpop.f32.mrf.mxu2  ;;  %v447_v4 = vpop.f32.mrf.mxu0 }
  0xe2   : > { %v775_v57 = vpop.f32.mrf.mxu3  ;;  %v661_v47 = vadd.f32 %v650_v8, %v547_v43  ;;  %v548_v58 = vpop.f32.mrf.mxu1 }
  0xe3   : > { %v549_v28 = vadd.f32 %v548_v58, %v447_v4 }
  0xe4   : > { %v786_v5 = vadd.f32 %v775_v57, %v661_v47 }
  0xe6   : > { %v797_v3 = vadd.f32 %v3259_v60, %v786_v5 }
  0xe8   : > { %805 = vst [vmem:[%s3264_s30 + $0xc0] sm:$0xff] %v797_v3 }
  0xe9   : > { %v652_v61 = vpop.f32.mrf.mxu2  ;;  %v957_v13 = vpop.f32.mrf.mxu0 }
  0xea   : > { %v777_v33 = vpop.f32.mrf.mxu3  ;;  %v662_v31 = vadd.f32 %v652_v61, %v549_v28  ;;  %v1034_v42 = vpop.f32.mrf.mxu1 }
  0xeb   : > { %v1035_v21 = vadd.f32 %v1034_v42, %v957_v13 }
  0xec   : > { %v787_v14 = vadd.f32 %v777_v33, %v662_v31  ;;  %1808 = vmatmul.bf16.vlgmr.msrb.gmra.mxu0 %v3162_v6 }
  0xed   : > { %1885 = vmatmul.bf16.vlgmr.msrb.gmra.mxu1 %v3049_v30 }
  0xee   : > { %v798_v54 = vadd.f32 %v3259_v60, %v787_v14  ;;  %1979 = vmatmul.bf16.vlgmr.msrb.gmra.mxu2 %v3090_v24 }
  0xef   : > { %2089 = vmatmul.bf16.vlgmr.msrb.gmra.mxu3 %v3176_v63 }
  0xf0   : > { %806 = vst [vmem:[%s3264_s30 + $0xe0] sm:$0xff] %v798_v54 }
  0xf1   : > { %v1128_v0 = vpop.f32.mrf.mxu2  ;;  %v959_v22 = vpop.f32.mrf.mxu0 }
  0xf2   : > { %v1244_v1 = vpop.f32.mrf.mxu3  ;;  %v1148_v15 = vadd.f32 %v1128_v0, %v1035_v21  ;;  %v1036_v29 = vpop.f32.mrf.mxu1 }
  0xf3   : > { %v1037_v6 = vadd.f32 %v1036_v29, %v959_v22 }
  0xf4   : > { %v1264_v56 = vadd.f32 %v1244_v1, %v1148_v15 }
  0xf6   : > { %v1272_v27 = vadd.f32 %v3259_v60, %v1264_v56 }
  0xf8   : > { %1280 = vst [vmem:[%s3264_s30 + $0x8] sm:$0xff] %v1272_v27 }
  0xf9   : > { %v1130_v30 = vpop.f32.mrf.mxu2  ;;  %v962_v41 = vpop.f32.mrf.mxu0 }
  0xfa   : > { %v1246_v9 = vpop.f32.mrf.mxu3  ;;  %v1149_v39 = vadd.f32 %v1130_v30, %v1037_v6  ;;  %v1039_v7 = vpop.f32.mrf.mxu1 }
  0xfb   : > { %v1040_v35 = vadd.f32 %v1039_v7, %v962_v41 }
  0xfc   : > { %v1265_v24 = vadd.f32 %v1246_v9, %v1149_v39  ;;  %1813 = vmatmul.bf16.gmra.mxu0 %v3200_v10 }
  0xfd   : > { %1890 = vmatmul.bf16.gmra.mxu1 %v3098_v11 }
  0xfe   : > { %v1273_v63 = vadd.f32 %v3259_v60, %v1265_v24  ;;  %1984 = vmatmul.bf16.gmra.mxu2 %v3145_v36 }
  0xff   : > { %2094 = vmatmul.bf16.gmra.mxu3 %v3210_v51 }
 0x100   : > { %1281 = vst [vmem:[%s3264_s30 + $0x28] sm:$0xff] %v1273_v63 }
 0x101   : > { %v1133_v48 = vpop.f32.mrf.mxu2  ;;  %v964_v50 = vpop.f32.mrf.mxu0 }
 0x102   : > { %v1249_v20 = vpop.f32.mrf.mxu3  ;;  %v1150_v49 = vadd.f32 %v1133_v48, %v1040_v35  ;;  %v1041_v40 = vpop.f32.mrf.mxu1 }
 0x103   : > { %v1042_v10 = vadd.f32 %v1041_v40, %v964_v50 }
 0x104   : > { %v1266_v26 = vadd.f32 %v1249_v20, %v1150_v49 }
 0x106   : > { %v1274_v2 = vadd.f32 %v3259_v60, %v1266_v26 }
 0x108   : > { %1282 = vst [vmem:[%s3264_s30 + $0x48] sm:$0xff] %v1274_v2 }
 0x109   : > { %v1135_v11 = vpop.f32.mrf.mxu2  ;;  %v967_v37 = vpop.f32.mrf.mxu0 }
 0x10a   : > { %v1251_v52 = vpop.f32.mrf.mxu3  ;;  %v1151_v32 = vadd.f32 %v1135_v11, %v1042_v10  ;;  %v1044_v16 = vpop.f32.mrf.mxu1 }
 0x10b   : > { %v1045_v17 = vadd.f32 %v1044_v16, %v967_v37 }
 0x10c   : > { %v1267_v36 = vadd.f32 %v1251_v52, %v1151_v32  ;;  %1818 = vmatmul.bf16.gmra.mxu0 %v3216_v55 }
 0x10d   : > { %1895 = vmatmul.bf16.gmra.mxu1 %v3159_v23  ;;  %v2012_v23 = vsel %vm3114_vm5, %v2708_v18, %v2011_v19 }
 0x10e   : > { %v1275_v51 = vadd.f32 %v3259_v60, %v1267_v36  ;;  %1989 = vmatmul.bf16.gmra.mxu2 %v3185_v25  ;;  %v2030_v5 = vunpack.c.l.b16 %v2012_v23 }
 0x10f   : > { %2099 = vmatmul.bf16.gmra.mxu3 %v3226_v62 }
 0x110   : > { %1283 = vst [vmem:[%s3264_s30 + $0x68] sm:$0xff] %v1275_v51  ;;  %v2031_v61 = vpack.c.b16 %v2030_v5, %v1178_v38 }
 0x111   : > { %v1138_v43 = vpop.f32.mrf.mxu2  ;;  %v969_v47 = vpop.f32.mrf.mxu0 }
 0x112   : > { %v1254_v8 = vpop.f32.mrf.mxu3  ;;  %v1152_v57 = vadd.f32 %v1138_v43, %v1045_v17  ;;  %v1046_v55 = vpop.f32.mrf.mxu1 }
 0x113   : > { %v1047_v25 = vadd.f32 %v1046_v55, %v969_v47 }
 0x114   : > { %v1268_v4 = vadd.f32 %v1254_v8, %v1152_v57 }
 0x116   : > { %v1276_v58 = vadd.f32 %v3259_v60, %v1268_v4 }
 0x118   : > { %1284 = vst [vmem:[%s3264_s30 + $0x88] sm:$0xff] %v1276_v58 }
 0x119   : > { %v1140_v62 = vpop.f32.mrf.mxu2  ;;  %v972_v59 = vpop.f32.mrf.mxu0 }
 0x11a   : > { %v1256_v44 = vpop.f32.mrf.mxu3  ;;  %v1153_v3 = vadd.f32 %v1140_v62, %v1047_v25  ;;  %v1049_v28 = vpop.f32.mrf.mxu1 }
 0x11b   : > { %v1050_v31 = vadd.f32 %v1049_v28, %v972_v59 }
 0x11c   : > { %v1269_v33 = vadd.f32 %v1256_v44, %v1153_v3  ;;  %1823 = vmatmul.bf16.gmra.mxu0 %v3245_v46 }
 0x11d   : > { %1900 = vmatmul.bf16.gmra.mxu1 %v3198_v34 }
 0x11e   : > { %v1277_v53 = vadd.f32 %v3259_v60, %v1269_v33  ;;  %1994 = vmatmul.bf16.gmra.mxu2 %v3299_v45 }
 0x11f   : > { %2104 = vmatmul.bf16.gmra.mxu3 %v2031_v61 }
 0x120   : > { %1285 = vst [vmem:[%s3264_s30 + $0xa8] sm:$0xff] %v1277_v53 }
 0x121   : > { %v1143_v13 = vpop.f32.mrf.mxu2  ;;  %v974_v54 = vpop.f32.mrf.mxu0 }
 0x122   : > { %v1259_v42 = vpop.f32.mrf.mxu3  ;;  %v1154_v14 = vadd.f32 %v1143_v13, %v1050_v31  ;;  %v1051_v12 = vpop.f32.mrf.mxu1 }
 0x123   : > { %v1052_v46 = vadd.f32 %v1051_v12, %v974_v54 }
 0x124   : > { %v1270_v38 = vadd.f32 %v1259_v42, %v1154_v14 }
 0x126   : > { %v1278_v21 = vadd.f32 %v3259_v60, %v1270_v38 }
 0x128   : > { %1286 = vst [vmem:[%s3264_s30 + $0xc8] sm:$0xff] %v1278_v21 }
 0x129   : > { %v1145_v0 = vpop.f32.mrf.mxu2  ;;  %v1379_v15 = vpop.f32.mrf.mxu0 }
 0x12a   : > { %v1261_v34 = vpop.f32.mrf.mxu3  ;;  %v1155_v1 = vadd.f32 %v1145_v0, %v1052_v46  ;;  %v1456_v22 = vpop.f32.mrf.mxu1 }
 0x12b   : > { %v1457_v56 = vadd.f32 %v1456_v22, %v1379_v15 }
 0x12c   : > { %v1271_v45 = vadd.f32 %v1261_v34, %v1155_v1 }
 0x12e   : > { %v1279_v29 = vadd.f32 %v3259_v60, %v1271_v45 }
 0x130   : > { %1287 = vst [vmem:[%s3264_s30 + $0xe8] sm:$0xff] %v1279_v29 }
 0x131   : > { %v1554_v27 = vpop.f32.mrf.mxu2  ;;  %v1381_v9 = vpop.f32.mrf.mxu0 }
 0x132   : > { %v1673_v6 = vpop.f32.mrf.mxu3  ;;  %v1574_v30 = vadd.f32 %v1554_v27, %v1457_v56  ;;  %v1458_v39 = vpop.f32.mrf.mxu1 }
 0x133   : > { %v1459_v24 = vadd.f32 %v1458_v39, %v1381_v9 }
 0x134   : > { %v1693_v41 = vadd.f32 %v1673_v6, %v1574_v30 }
 0x136   : > { %v1701_v7 = vadd.f32 %v3259_v60, %v1693_v41 }
 0x138   : > { %2604 = vst [vmem:[%s3264_s30 + $0x10] sm:$0xff] %v1701_v7 }
 0x139   : > { %v1556_v63 = vpop.f32.mrf.mxu2  ;;  %v1384_v20 = vpop.f32.mrf.mxu0 }
 0x13a   : > { %v1675_v35 = vpop.f32.mrf.mxu3  ;;  %v1575_v48 = vadd.f32 %v1556_v63, %v1459_v24  ;;  %v1461_v49 = vpop.f32.mrf.mxu1 }
 0x13b   : > { %v1462_v26 = vadd.f32 %v1461_v49, %v1384_v20 }
 0x13c   : > { %v1694_v50 = vadd.f32 %v1675_v35, %v1575_v48 }
 0x13e   : > { %v1702_v40 = vadd.f32 %v3259_v60, %v1694_v50 }
 0x140   : > { %2605 = vst [vmem:[%s3264_s30 + $0x30] sm:$0xff] %v1702_v40 }
 0x141   : > { %v1559_v2 = vpop.f32.mrf.mxu2  ;;  %v1386_v52 = vpop.f32.mrf.mxu0 }
 0x142   : > { %v1678_v10 = vpop.f32.mrf.mxu3  ;;  %v1576_v11 = vadd.f32 %v1559_v2, %v1462_v26  ;;  %v1463_v32 = vpop.f32.mrf.mxu1 }
 0x143   : > { %v1464_v36 = vadd.f32 %v1463_v32, %v1386_v52 }
 0x144   : > { %v1695_v37 = vadd.f32 %v1678_v10, %v1576_v11 }
 0x146   : > { %v1703_v16 = vadd.f32 %v3259_v60, %v1695_v37 }
 0x148   : > { %2606 = vst [vmem:[%s3264_s30 + $0x50] sm:$0xff] %v1703_v16 }
 0x149   : > { %v1561_v51 = vpop.f32.mrf.mxu2  ;;  %v1389_v19 = vpop.f32.mrf.mxu0 }
 0x14a   : > { %v1680_v17 = vpop.f32.mrf.mxu3  ;;  %v1577_v18 = vadd.f32 %v1561_v51, %v1464_v36  ;;  %v1466_v43 = vpop.f32.mrf.mxu1 }
 0x14b   : > { %v1467_v47 = vadd.f32 %v1466_v43, %v1389_v19 }
 0x14c   : > { %v1696_v8 = vadd.f32 %v1680_v17, %v1577_v18 }
 0x14e   : > { %v1704_v57 = vadd.f32 %v3259_v60, %v1696_v8 }
 0x150   : > { %2607 = vst [vmem:[%s3264_s30 + $0x70] sm:$0xff] %v1704_v57 }
 0x151   : > { %v1564_v55 = vpop.f32.mrf.mxu2  ;;  %v1391_v58 = vpop.f32.mrf.mxu0 }
 0x152   : > { %v1683_v23 = vpop.f32.mrf.mxu3  ;;  %v1578_v4 = vadd.f32 %v1564_v55, %v1467_v47  ;;  %v1468_v5 = vpop.f32.mrf.mxu1 }
 0x153   : > { %v1469_v44 = vadd.f32 %v1468_v5, %v1391_v58 }
 0x154   : > { %v1697_v25 = vadd.f32 %v1683_v23, %v1578_v4 }
 0x156   : > { %v1705_v62 = vadd.f32 %v3259_v60, %v1697_v25 }
 0x158   : > { %2608 = vst [vmem:[%s3264_s30 + $0x90] sm:$0xff] %v1705_v62 }
 0x159   : > { %v1566_v3 = vpop.f32.mrf.mxu2  ;;  %v1394_v61 = vpop.f32.mrf.mxu0 }
 0x15a   : > { %v1685_v59 = vpop.f32.mrf.mxu3  ;;  %v1579_v28 = vadd.f32 %v1566_v3, %v1469_v44  ;;  %v1471_v33 = vpop.f32.mrf.mxu1 }
 0x15b   : > { %v1472_v13 = vadd.f32 %v1471_v33, %v1394_v61 }
 0x15c   : > { %v1698_v53 = vadd.f32 %v1685_v59, %v1579_v28 }
 0x15e   : > { %v1706_v31 = vadd.f32 %v3259_v60, %v1698_v53 }
 0x160   : > { %2609 = vst [vmem:[%s3264_s30 + $0xb0] sm:$0xff] %v1706_v31 }
 0x161   : > { %v1569_v42 = vpop.f32.mrf.mxu2  ;;  %v1396_v12 = vpop.f32.mrf.mxu0 }
 0x162   : > { %v1688_v14 = vpop.f32.mrf.mxu3  ;;  %v1580_v54 = vadd.f32 %v1569_v42, %v1472_v13  ;;  %v1473_v38 = vpop.f32.mrf.mxu1 }
 0x163   : > { %v1474_v0 = vadd.f32 %v1473_v38, %v1396_v12 }
 0x164   : > { %v1699_v21 = vadd.f32 %v1688_v14, %v1580_v54 }
 0x166   : > { %v1707_v46 = vadd.f32 %v3259_v60, %v1699_v21 }
 0x168   : > { %2610 = vst [vmem:[%s3264_s30 + $0xd0] sm:$0xff] %v1707_v46 }
 0x169   : > { %v1571_v34 = vpop.f32.mrf.mxu2  ;;  %v1809_v22 = vpop.f32.mrf.mxu0 }
 0x16a   : > { %v1690_v1 = vpop.f32.mrf.mxu3  ;;  %v1581_v15 = vadd.f32 %v1571_v34, %v1474_v0  ;;  %v1886_v45 = vpop.f32.mrf.mxu1 }
 0x16b   : > { %v1887_v27 = vadd.f32 %v1886_v45, %v1809_v22 }
 0x16c   : > { %v1700_v29 = vadd.f32 %v1690_v1, %v1581_v15 }
 0x16e   : > { %v1708_v56 = vadd.f32 %v3259_v60, %v1700_v29 }
 0x170   : > { %2611 = vst [vmem:[%s3264_s30 + $0xf0] sm:$0xff] %v1708_v56 }
 0x171   : > { %v1980_v6 = vpop.f32.mrf.mxu2  ;;  %v1811_v39 = vpop.f32.mrf.mxu0 }
 0x172   : > { %v2090_v30 = vpop.f32.mrf.mxu3  ;;  %v2000_v9 = vadd.f32 %v1980_v6, %v1887_v27  ;;  %v1888_v41 = vpop.f32.mrf.mxu1 }
 0x173   : > { %v1889_v63 = vadd.f32 %v1888_v41, %v1811_v39 }
 0x174   : > { %v2110_v7 = vadd.f32 %v2090_v30, %v2000_v9 }
 0x176   : > { %v2118_v24 = vadd.f32 %v3259_v60, %v2110_v7 }
 0x178   : > { %2741 = vst [vmem:[%s3264_s30 + $0x18] sm:$0xff] %v2118_v24 }
 0x179   : > { %v1982_v35 = vpop.f32.mrf.mxu2  ;;  %v1814_v49 = vpop.f32.mrf.mxu0 }
 0x17a   : > { %v2092_v48 = vpop.f32.mrf.mxu3  ;;  %v2001_v20 = vadd.f32 %v1982_v35, %v1889_v63  ;;  %v1891_v50 = vpop.f32.mrf.mxu1 }
 0x17b   : > { %v1892_v2 = vadd.f32 %v1891_v50, %v1814_v49 }
 0x17c   : > { %v2111_v40 = vadd.f32 %v2092_v48, %v2001_v20 }
 0x17e   : > { %v2119_v26 = vadd.f32 %v3259_v60, %v2111_v40 }
 0x180   : > { %2742 = vst [vmem:[%s3264_s30 + $0x38] sm:$0xff] %v2119_v26 }
 0x181   : > { %v1985_v10 = vpop.f32.mrf.mxu2  ;;  %v1816_v32 = vpop.f32.mrf.mxu0 }
 0x182   : > { %v2095_v11 = vpop.f32.mrf.mxu3  ;;  %v2002_v52 = vadd.f32 %v1985_v10, %v1892_v2  ;;  %v1893_v37 = vpop.f32.mrf.mxu1 }
 0x183   : > { %v1894_v51 = vadd.f32 %v1893_v37, %v1816_v32 }
 0x184   : > { %v2112_v16 = vadd.f32 %v2095_v11, %v2002_v52 }
 0x186   : > { %v2120_v36 = vadd.f32 %v3259_v60, %v2112_v16 }
 0x188   : > { %2743 = vst [vmem:[%s3264_s30 + $0x58] sm:$0xff] %v2120_v36 }
 0x189   : > { %v1987_v17 = vpop.f32.mrf.mxu2  ;;  %v1819_v43 = vpop.f32.mrf.mxu0 }
 0x18a   : > { %v2097_v18 = vpop.f32.mrf.mxu3  ;;  %v2003_v19 = vadd.f32 %v1987_v17, %v1894_v51  ;;  %v1896_v8 = vpop.f32.mrf.mxu1 }
 0x18b   : > { %v1897_v55 = vadd.f32 %v1896_v8, %v1819_v43 }
 0x18c   : > { %v2113_v57 = vadd.f32 %v2097_v18, %v2003_v19 }
 0x18e   : > { %v2121_v47 = vadd.f32 %v3259_v60, %v2113_v57 }
 0x190   : > { %2744 = vst [vmem:[%s3264_s30 + $0x78] sm:$0xff] %v2121_v47 }
 0x191   : > { %v1990_v23 = vpop.f32.mrf.mxu2  ;;  %v1821_v5 = vpop.f32.mrf.mxu0 }
 0x192   : > { %v2100_v4 = vpop.f32.mrf.mxu3  ;;  %v2004_v58 = vadd.f32 %v1990_v23, %v1897_v55  ;;  %v1898_v25 = vpop.f32.mrf.mxu1 }
 0x193   : > { %v1899_v3 = vadd.f32 %v1898_v25, %v1821_v5 }
 0x194   : > { %v2114_v62 = vadd.f32 %v2100_v4, %v2004_v58 }
 0x196   : > { %v2122_v44 = vadd.f32 %v3259_v60, %v2114_v62 }
 0x198   : > { %2745 = vst [vmem:[%s3264_s30 + $0x98] sm:$0xff] %v2122_v44 }
 0x199   : > { %v1992_v59 = vpop.f32.mrf.mxu2  ;;  %v1824_v33 = vpop.f32.mrf.mxu0 }
 0x19a   : > { %v2102_v28 = vpop.f32.mrf.mxu3  ;;  %v2005_v61 = vadd.f32 %v1992_v59, %v1899_v3  ;;  %v1901_v53 = vpop.f32.mrf.mxu1 }
 0x19b   : > { %v1902_v42 = vadd.f32 %v1901_v53, %v1824_v33 }
 0x19c   : > { %v2115_v31 = vadd.f32 %v2102_v28, %v2005_v61 }
 0x19e   : > { %v2123_v13 = vadd.f32 %v3259_v60, %v2115_v31 }
 0x1a0   : > { %2746 = vst [vmem:[%s3264_s30 + $0xb8] sm:$0xff] %v2123_v13 }
 0x1a1   : > { %v1995_v14 = vpop.f32.mrf.mxu2  ;;  %v1826_v21 = vpop.f32.mrf.mxu0 }
 0x1a2   : > { %v2105_v54 = vpop.f32.mrf.mxu3  ;;  %v2006_v12 = vadd.f32 %v1995_v14, %v1902_v42  ;;  %v1903_v46 = vpop.f32.mrf.mxu1 }
 0x1a3   : > { %v1904_v34 = vadd.f32 %v1903_v46, %v1826_v21 }
 0x1a4   : > { %v2116_v38 = vadd.f32 %v2105_v54, %v2006_v12 }
 0x1a6   : > { %v2124_v0 = vadd.f32 %v3259_v60, %v2116_v38 }
 0x1a8   : > { %2747 = vst [vmem:[%s3264_s30 + $0xd8] sm:$0xff] %v2124_v0 }
 0x1a9   : > { %v1997_v1 = vpop.f32.mrf.mxu2 }
 0x1aa   : > { %v2007_v15 = vadd.f32 %v1997_v1, %v1904_v34  ;;  %v2107_v22 = vpop.f32.mrf.mxu3 }
 0x1ac   : > { %v2117_v45 = vadd.f32 %v2107_v22, %v2007_v15 }
 0x1ae   : > { %v2125_v29 = vadd.f32 %v3259_v60, %v2117_v45 }
 0x1b0   : > { %2748 = vst [vmem:[%s3264_s30 + $0xf8] sm:$0xff] %v2125_v29 }
 0x1b1 PF: > { %s14_s12 = sadd.s32 1, %s2943_s12  }
 0x1b2   : > { %p11_p7 = scmp.ge.s32.totalorder %s14_s12, 4  }
 0x1b4   :  { %13 = sbr.rel (!%p11_p7) target bundleno = 1 (0x1), region = 83 }
 0x1b9   :  { %2155 = vsyncpa [#allocation3], 1 }
 0x1ba   :  { %2157 = vsyncpa [#allocation3 + $0x1], 1 }

</bundles_post_ra>
